<compile_context>
chip_gen: v7x
topology: tpu7x:2x2x1
jax: 0.10.0
libtpu: 0.0.40
codegen_flags: <defaults>
</compile_context>

<pallas_src>
import functools

import jax
import jax.numpy as jnp
from jax.experimental import pallas as pl
from jax.experimental.pallas import tpu as pltpu

MATMUL_DTYPE = jnp.bfloat16  # MXU operand dtype (f32 accumulation everywhere)


def _layernorm(x, gamma, beta, eps=1e-5):
    mu = jnp.mean(x, axis=-1, keepdims=True)
    var = jnp.mean((x - mu) ** 2, axis=-1, keepdims=True)
    return (x - mu) * jax.lax.rsqrt(var + eps) * gamma + beta


def transformer_block_kernel(
    # activations (Bt batch elements per grid step)
    v_ref, k_ref, q_ref, mask_ref,
    # attention weights: block-diagonal projections, per-head fc_out, bias
    wvbd_ref, wkbd_ref, wqbd_ref, wo_ref, bo_ref,
    # layernorm params
    g1_ref, b1_ref, g2_ref, b2_ref,
    # feed-forward weights (pre-transposed)
    w1_ref, bf1_ref, w2_ref, bf2_ref,
    # output
    out_ref,
    *, heads: int, head_dim: int, embed_size: int, bt: int, seq: int,
):
    E = embed_size
    mm = MATMUL_DTYPE
    inv_sqrt_e = jnp.float32(1.0 / (embed_size ** 0.5))
    # scale is folded into q, so the mask fill is pre-scaled to match the
    # original masked_fill(-1e20) followed by "/ sqrt(E)".
    fill = jnp.float32(-1e20 / (embed_size ** 0.5))

    q2 = q_ref[...].reshape(bt * seq, E)   # f32, also used for the residual
    k2 = k_ref[...].reshape(bt * seq, E)
    v2 = v_ref[...].reshape(bt * seq, E)

    # Fused full-width projections (one MXU matmul each, block-diagonal W).
    qp = jnp.dot((q2 * inv_sqrt_e).astype(mm), wqbd_ref[...],
                 preferred_element_type=jnp.float32)            # (Bt*S, E)
    kp = jnp.dot(k2.astype(mm), wkbd_ref[...],
                 preferred_element_type=jnp.float32)            # (Bt*S, E)
    vp = jnp.dot(v2.astype(mm), wvbd_ref[...],
                 preferred_element_type=jnp.float32)            # (Bt*S, E)

    # Cast once (full width) before the head loop -> heads x fewer VPU casts.
    qp3 = qp.reshape(bt, seq, E).astype(mm)
    kp3 = kp.reshape(bt, seq, E).astype(mm)
    vp3 = vp.reshape(bt, seq, E).astype(mm)

    # head-invariant mask compare, hoisted out of the head loop
    mask_zero = mask_ref[...] == 0                              # (Bt, S, S)

    # accumulate fc_out projection per head (no lane-axis concat); seed with bias
    attn_acc = jnp.broadcast_to(bo_ref[...], (bt * seq, E)).astype(jnp.float32)
    for h in range(heads):                                      # static unroll
        sl = slice(h * head_dim, (h + 1) * head_dim)
        qh = qp3[:, :, sl]                                      # (Bt, S, hd) bf16
        kh = kp3[:, :, sl]
        vh = vp3[:, :, sl]

        energy = jnp.einsum("bqd,bkd->bqk", qh, kh,
                            preferred_element_type=jnp.float32)  # (Bt, S, S)
        energy = jnp.where(mask_zero, fill, energy)

        # numerically-stable softmax over the key dim
        m = jnp.max(energy, axis=-1, keepdims=True)
        p = jnp.exp(energy - m)
        att = p * pl.reciprocal(jnp.sum(p, axis=-1, keepdims=True), approx=True)

        head_out = jnp.einsum("bqk,bkd->bqd", att.astype(mm), vh,
                              preferred_element_type=jnp.float32)  # (Bt, S, hd)

        attn_acc = attn_acc + jnp.dot(
            head_out.reshape(bt * seq, head_dim).astype(mm),
            wo_ref[h],                                           # (hd, E)
            preferred_element_type=jnp.float32)                  # (Bt*S, E)

    # add & norm 1 (dropout is identity)
    x = _layernorm(attn_acc + q2, g1_ref[...], b1_ref[...])

    # feed-forward: Linear -> ReLU -> Linear
    h1 = jnp.maximum(
        jnp.dot(x.astype(mm), w1_ref[...],
                preferred_element_type=jnp.float32) + bf1_ref[...], 0.0)
    ff = jnp.dot(h1.astype(mm), w2_ref[...],
                 preferred_element_type=jnp.float32) + bf2_ref[...]

    # add & norm 2 (dropout is identity)
    out = _layernorm(ff + x, g2_ref[...], b2_ref[...])
    out_ref[...] = out.reshape(bt, seq, E)


def transformer_block(value, key, query, mask, params,
                      *, embed_size, heads, forward_expansion):
    N, S, E = query.shape
    assert E == embed_size and embed_size % heads == 0
    hd = embed_size // heads
    H = forward_expansion * embed_size
    mm = MATMUL_DTYPE

    # --- weight prep (glue, not hot path) ---------------------------------
    eye = jnp.eye(heads, dtype=jnp.float32)
    # block-diagonal (E, E) projections; each diagonal block is W.T so the
    # kernel computes x @ W_bd  ==  per-head x_h @ W.T  (shared Linear).
    wq_bd = jnp.kron(eye, params["wq"].T).astype(mm)
    wk_bd = jnp.kron(eye, params["wk"].T).astype(mm)
    wv_bd = jnp.kron(eye, params["wv"].T).astype(mm)
    # fc_out, split per head along the input (concat) dimension
    wo_r = params["wo"].T.reshape(heads, hd, E).astype(mm)      # (heads, hd, E)
    w1_t = params["w1"].T.astype(mm)                            # (E, H)
    w2_t = params["w2"].T.astype(mm)                            # (H, E)
    bo = params["bo"].reshape(1, E).astype(jnp.float32)
    bf1 = params["bf1"].reshape(1, H).astype(jnp.float32)
    bf2 = params["bf2"].reshape(1, E).astype(jnp.float32)
    g1 = params["g1"].reshape(1, E).astype(jnp.float32)
    b1 = params["b1"].reshape(1, E).astype(jnp.float32)
    g2 = params["g2"].reshape(1, E).astype(jnp.float32)
    b2 = params["b2"].reshape(1, E).astype(jnp.float32)

    # --- batch tiling: largest divisor of N keeping Bt*S rows bounded -----
    bt = 1
    for d in range(1, N + 1):
        if N % d == 0 and d * S <= 512:
            bt = d

    batch_spec = pl.BlockSpec((bt, S, E), lambda n: (n, 0, 0))
    mask_spec = pl.BlockSpec((bt, S, S), lambda n: (n, 0, 0))

    def full_spec(a):
        return pl.BlockSpec(a.shape, lambda n, _nd=a.ndim: (0,) * _nd)

    weights = [wv_bd, wk_bd, wq_bd, wo_r, bo, g1, b1, g2, b2, w1_t, bf1, w2_t, bf2]

    kernel = functools.partial(
        transformer_block_kernel,
        heads=heads, head_dim=hd, embed_size=embed_size, bt=bt, seq=S,
    )

    return pl.pallas_call(
        kernel,
        out_shape=jax.ShapeDtypeStruct((N, S, E), jnp.float32),
        grid_spec=pltpu.PrefetchScalarGridSpec(
            num_scalar_prefetch=0,
            grid=(N // bt,),
            in_specs=[batch_spec, batch_spec, batch_spec, mask_spec]
                     + [full_spec(w) for w in weights],
            out_specs=pl.BlockSpec((bt, S, E), lambda n: (n, 0, 0)),
        ),
        compiler_params=pltpu.CompilerParams(
            # batch axis is fully independent -> shard across TCs on v7x
            dimension_semantics=("parallel",),
            vmem_limit_bytes=32 * 1024 * 1024,
        ),
    )(value, key, query, mask, *weights)


def transformer_block_ref(value, key, query, mask, params,
                          *, embed_size, heads, forward_expansion):
    """Pure-JAX reference mirroring the PyTorch forward (f32 throughout)."""
    N, S, E = query.shape
    hd = embed_size // heads
    v = value.reshape(N, S, heads, hd) @ params["wv"].T
    k = key.reshape(N, S, heads, hd) @ params["wk"].T
    q = query.reshape(N, S, heads, hd) @ params["wq"].T
    energy = jnp.einsum("nqhd,nkhd->nhqk", q, k)
    energy = jnp.where(mask[:, None, :, :] == 0, -1e20, energy)
    att = jax.nn.softmax(energy / (embed_size ** 0.5), axis=3)
    out = jnp.einsum("nhql,nlhd->nqhd", att, v).reshape(N, S, E)
    out = out @ params["wo"].T + params["bo"]

    def ln(x, g, b):
        mu = x.mean(-1, keepdims=True)
        var = ((x - mu) ** 2).mean(-1, keepdims=True)
        return (x - mu) / jnp.sqrt(var + 1e-5) * g + b

    x = ln(out + query, params["g1"], params["b1"])
    ff = jnp.maximum(x @ params["w1"].T + params["bf1"], 0.0) @ params["w2"].T + params["bf2"]
    return ln(ff + x, params["g2"], params["b2"])


if __name__ == "__main__":
    # small shapes consistent with the module
    N, S = 2, 8
    embed_size, heads, forward_expansion = 32, 4, 4
    hd = embed_size // heads
    H = forward_expansion * embed_size

    key0 = jax.random.PRNGKey(0)
    ks = jax.random.split(key0, 16)

    value = jax.random.normal(ks[0], (N, S, embed_size), jnp.float32)
    key_in = jax.random.normal(ks[1], (N, S, embed_size), jnp.float32)
    query = jax.random.normal(ks[2], (N, S, embed_size), jnp.float32)
    mask = jnp.ones((N, S, S), jnp.int32)   # all-visible mask (mask path exercised)

    params = {
        "wv": jax.random.normal(ks[3], (hd, hd), jnp.float32) * 0.1,
        "wk": jax.random.normal(ks[4], (hd, hd), jnp.float32) * 0.1,
        "wq": jax.random.normal(ks[5], (hd, hd), jnp.float32) * 0.1,
        "wo": jax.random.normal(ks[6], (embed_size, embed_size), jnp.float32) * 0.1,
        "bo": jax.random.normal(ks[7], (embed_size,), jnp.float32) * 0.1,
        "g1": jnp.ones((embed_size,), jnp.float32),
        "b1": jnp.zeros((embed_size,), jnp.float32),
        "g2": jnp.ones((embed_size,), jnp.float32),
        "b2": jnp.zeros((embed_size,), jnp.float32),
        "w1": jax.random.normal(ks[8], (H, embed_size), jnp.float32) * 0.1,
        "bf1": jax.random.normal(ks[9], (H,), jnp.float32) * 0.1,
        "w2": jax.random.normal(ks[10], (embed_size, H), jnp.float32) * 0.1,
        "bf2": jax.random.normal(ks[11], (embed_size,), jnp.float32) * 0.1,
    }

    # TODO(synk): nn.Dropout has no deterministic Pallas equivalent in eval mode; it is identity here.
    out = transformer_block(
        value, key_in, query, mask, params,
        embed_size=embed_size, heads=heads, forward_expansion=forward_expansion,
    )
    out = jax.block_until_ready(out)

    ref = transformer_block_ref(
        value, key_in, query, mask, params,
        embed_size=embed_size, heads=heads, forward_expansion=forward_expansion,
    )
    assert out.shape == (N, S, embed_size)
    # bf16 matmuls + approx reciprocal => slightly looser tolerance than f32
    assert jnp.allclose(out, ref, rtol=2e-2, atol=2e-2), "mismatch vs pure-JAX reference"

    print("KERNEL_OK")
</pallas_src>

<mosaic_0001>
module attributes {stable_mosaic.version = 11 : i64} {
  func.func @transformer_block_kernel(%arg0: i32, %arg1: memref<2x8x32xf32, #tpu.memory_space<vmem>>, %arg2: memref<2x8x32xf32, #tpu.memory_space<vmem>>, %arg3: memref<2x8x32xf32, #tpu.memory_space<vmem>>, %arg4: memref<2x8x8xi32, #tpu.memory_space<vmem>>, %arg5: memref<32x32xbf16, #tpu.memory_space<vmem>>, %arg6: memref<32x32xbf16, #tpu.memory_space<vmem>>, %arg7: memref<32x32xbf16, #tpu.memory_space<vmem>>, %arg8: memref<4x8x32xbf16, #tpu.memory_space<vmem>>, %arg9: memref<1x32xf32, #tpu.memory_space<vmem>>, %arg10: memref<1x32xf32, #tpu.memory_space<vmem>>, %arg11: memref<1x32xf32, #tpu.memory_space<vmem>>, %arg12: memref<1x32xf32, #tpu.memory_space<vmem>>, %arg13: memref<1x32xf32, #tpu.memory_space<vmem>>, %arg14: memref<32x128xbf16, #tpu.memory_space<vmem>>, %arg15: memref<1x128xf32, #tpu.memory_space<vmem>>, %arg16: memref<128x32xbf16, #tpu.memory_space<vmem>>, %arg17: memref<1x32xf32, #tpu.memory_space<vmem>>, %arg18: memref<2x8x32xf32, #tpu.memory_space<vmem>>) attributes {dimension_semantics = [#tpu.dimension_semantics<parallel>], iteration_bounds = array<i64: 1>, scalar_prefetch = 0 : i64, scratch_operands = 0 : i64, tpu.core_type = #tpu.core_type<tc>, window_params = [{transform_indices = @transform_0, window_bounds = array<i64: 2, 8, 32>}, {transform_indices = @transform_1, window_bounds = array<i64: 2, 8, 32>}, {transform_indices = @transform_2, window_bounds = array<i64: 2, 8, 32>}, {transform_indices = @transform_3, window_bounds = array<i64: 2, 8, 8>}, {pipeline_mode = #tpu.pipeline_mode<synchronous>, transform_indices = @transform_4, window_bounds = array<i64: 32, 32>}, {pipeline_mode = #tpu.pipeline_mode<synchronous>, transform_indices = @transform_5, window_bounds = array<i64: 32, 32>}, {pipeline_mode = #tpu.pipeline_mode<synchronous>, transform_indices = @transform_6, window_bounds = array<i64: 32, 32>}, {pipeline_mode = #tpu.pipeline_mode<synchronous>, transform_indices = @transform_7, window_bounds = array<i64: 4, 8, 32>}, {pipeline_mode = #tpu.pipeline_mode<synchronous>, transform_indices = @transform_8, window_bounds = array<i64: 1, 32>}, {pipeline_mode = #tpu.pipeline_mode<synchronous>, transform_indices = @transform_9, window_bounds = array<i64: 1, 32>}, {pipeline_mode = #tpu.pipeline_mode<synchronous>, transform_indices = @transform_10, window_bounds = array<i64: 1, 32>}, {pipeline_mode = #tpu.pipeline_mode<synchronous>, transform_indices = @transform_11, window_bounds = array<i64: 1, 32>}, {pipeline_mode = #tpu.pipeline_mode<synchronous>, transform_indices = @transform_12, window_bounds = array<i64: 1, 32>}, {pipeline_mode = #tpu.pipeline_mode<synchronous>, transform_indices = @transform_13, window_bounds = array<i64: 32, 128>}, {pipeline_mode = #tpu.pipeline_mode<synchronous>, transform_indices = @transform_14, window_bounds = array<i64: 1, 128>}, {pipeline_mode = #tpu.pipeline_mode<synchronous>, transform_indices = @transform_15, window_bounds = array<i64: 128, 32>}, {pipeline_mode = #tpu.pipeline_mode<synchronous>, transform_indices = @transform_16, window_bounds = array<i64: 1, 32>}, {transform_indices = @transform_17, window_bounds = array<i64: 2, 8, 32>}]} {
    %c0 = arith.constant 0 : index
    %c0_0 = arith.constant 0 : index
    %c0_1 = arith.constant 0 : index
    %0 = vector.load %arg3[%c0, %c0_0, %c0_1] : memref<2x8x32xf32, #tpu.memory_space<vmem>>, vector<2x8x32xf32>
    %1 = vector.shape_cast %0 : vector<2x8x32xf32> to vector<16x32xf32>
    %c0_2 = arith.constant 0 : index
    %c0_3 = arith.constant 0 : index
    %c0_4 = arith.constant 0 : index
    %2 = vector.load %arg2[%c0_2, %c0_3, %c0_4] : memref<2x8x32xf32, #tpu.memory_space<vmem>>, vector<2x8x32xf32>
    %3 = vector.shape_cast %2 : vector<2x8x32xf32> to vector<16x32xf32>
    %c0_5 = arith.constant 0 : index
    %c0_6 = arith.constant 0 : index
    %c0_7 = arith.constant 0 : index
    %4 = vector.load %arg1[%c0_5, %c0_6, %c0_7] : memref<2x8x32xf32, #tpu.memory_space<vmem>>, vector<2x8x32xf32>
    %5 = vector.shape_cast %4 : vector<2x8x32xf32> to vector<16x32xf32>
    %cst = arith.constant 0.176776692 : f32
    %6 = vector.broadcast %cst : f32 to vector<16x32xf32>
    %7 = arith.mulf %1, %6 : vector<16x32xf32>
    %8 = arith.truncf %7 : vector<16x32xf32> to vector<16x32xbf16>
    %c0_8 = arith.constant 0 : index
    %c0_9 = arith.constant 0 : index
    %9 = vector.load %arg7[%c0_8, %c0_9] : memref<32x32xbf16, #tpu.memory_space<vmem>>, vector<32x32xbf16>
    %cst_10 = arith.constant dense<0.000000e+00> : vector<16x32xf32>
    %10 = tpu.matmul %8, %9, %cst_10 {dimension_numbers = #tpu.dot_dimension_numbers<[1], [0], [0], [1], [0, 0, 1, 1], [], []>} : vector<16x32xbf16>, vector<32x32xbf16>, vector<16x32xf32> -> vector<16x32xf32>
    %11 = arith.truncf %3 : vector<16x32xf32> to vector<16x32xbf16>
    %c0_11 = arith.constant 0 : index
    %c0_12 = arith.constant 0 : index
    %12 = vector.load %arg6[%c0_11, %c0_12] : memref<32x32xbf16, #tpu.memory_space<vmem>>, vector<32x32xbf16>
    %cst_13 = arith.constant dense<0.000000e+00> : vector<16x32xf32>
    %13 = tpu.matmul %11, %12, %cst_13 {dimension_numbers = #tpu.dot_dimension_numbers<[1], [0], [0], [1], [0, 0, 1, 1], [], []>} : vector<16x32xbf16>, vector<32x32xbf16>, vector<16x32xf32> -> vector<16x32xf32>
    %14 = arith.truncf %5 : vector<16x32xf32> to vector<16x32xbf16>
    %c0_14 = arith.constant 0 : index
    %c0_15 = arith.constant 0 : index
    %15 = vector.load %arg5[%c0_14, %c0_15] : memref<32x32xbf16, #tpu.memory_space<vmem>>, vector<32x32xbf16>
    %cst_16 = arith.constant dense<0.000000e+00> : vector<16x32xf32>
    %16 = tpu.matmul %14, %15, %cst_16 {dimension_numbers = #tpu.dot_dimension_numbers<[1], [0], [0], [1], [0, 0, 1, 1], [], []>} : vector<16x32xbf16>, vector<32x32xbf16>, vector<16x32xf32> -> vector<16x32xf32>
    %17 = vector.shape_cast %10 : vector<16x32xf32> to vector<2x8x32xf32>
    %18 = arith.truncf %17 : vector<2x8x32xf32> to vector<2x8x32xbf16>
    %19 = vector.shape_cast %13 : vector<16x32xf32> to vector<2x8x32xf32>
    %20 = arith.truncf %19 : vector<2x8x32xf32> to vector<2x8x32xbf16>
    %21 = vector.shape_cast %16 : vector<16x32xf32> to vector<2x8x32xf32>
    %22 = arith.truncf %21 : vector<2x8x32xf32> to vector<2x8x32xbf16>
    %c0_17 = arith.constant 0 : index
    %c0_18 = arith.constant 0 : index
    %c0_19 = arith.constant 0 : index
    %23 = vector.load %arg4[%c0_17, %c0_18, %c0_19] : memref<2x8x8xi32, #tpu.memory_space<vmem>>, vector<2x8x8xi32>
    %c0_i32 = arith.constant 0 : i32
    %24 = vector.broadcast %c0_i32 : i32 to vector<2x8x8xi32>
    %25 = arith.cmpi eq, %23, %24 : vector<2x8x8xi32>
    %c0_20 = arith.constant 0 : index
    %c0_21 = arith.constant 0 : index
    %26 = vector.load %arg9[%c0_20, %c0_21] : memref<1x32xf32, #tpu.memory_space<vmem>>, vector<1x32xf32>
    %27 = vector.shape_cast %26 : vector<1x32xf32> to vector<1x32xf32>
    %28 = vector.broadcast %27 : vector<1x32xf32> to vector<16x32xf32>
    %29 = vector.extract_strided_slice %18 {offsets = [0, 0, 0], sizes = [2, 8, 8], strides = [1, 1, 1]} : vector<2x8x32xbf16> to vector<2x8x8xbf16>
    %30 = vector.extract_strided_slice %20 {offsets = [0, 0, 0], sizes = [2, 8, 8], strides = [1, 1, 1]} : vector<2x8x32xbf16> to vector<2x8x8xbf16>
    %31 = vector.extract_strided_slice %22 {offsets = [0, 0, 0], sizes = [2, 8, 8], strides = [1, 1, 1]} : vector<2x8x32xbf16> to vector<2x8x8xbf16>
    "tpu.trace_start"() <{level = 10 : i32, message = "bqd,bkd->bqk"}> : () -> ()
    %cst_22 = arith.constant dense<0.000000e+00> : vector<2x8x8xf32>
    %32 = tpu.matmul %29, %30, %cst_22 {dimension_numbers = #tpu.dot_dimension_numbers<[2], [2], [1], [1], [0, 0, 0, 1, 1, 1], [0], [0]>} : vector<2x8x8xbf16>, vector<2x8x8xbf16>, vector<2x8x8xf32> -> vector<2x8x8xf32>
    %cst_23 = arith.constant -1.76776698E+19 : f32
    "tpu.trace_stop"() : () -> ()
    %33 = vector.broadcast %cst_23 : f32 to vector<2x8x8xf32>
    %34 = arith.select %25, %33, %32 : vector<2x8x8xi1>, vector<2x8x8xf32>
    %cst_24 = arith.constant dense<0xFF800000> : vector<2x8xf32>
    %35 = vector.multi_reduction <maximumf>, %34, %cst_24 [2] : vector<2x8x8xf32> to vector<2x8xf32>
    %36 = vector.shape_cast %35 : vector<2x8xf32> to vector<2x8x1xf32>
    %37 = vector.broadcast %36 : vector<2x8x1xf32> to vector<2x8x8xf32>
    %38 = arith.subf %34, %37 : vector<2x8x8xf32>
    %39 = math.exp %38 : vector<2x8x8xf32>
    %cst_25 = arith.constant dense<0.000000e+00> : vector<2x8xf32>
    %40 = vector.multi_reduction <add>, %39, %cst_25 [2] : vector<2x8x8xf32> to vector<2x8xf32>
    %41 = vector.shape_cast %40 : vector<2x8xf32> to vector<2x8x1xf32>
    %42 = tpu.reciprocal %41 {approx = true} : vector<2x8x1xf32> -> vector<2x8x1xf32>
    %43 = vector.broadcast %42 : vector<2x8x1xf32> to vector<2x8x8xf32>
    %44 = arith.mulf %39, %43 : vector<2x8x8xf32>
    %45 = arith.truncf %44 : vector<2x8x8xf32> to vector<2x8x8xbf16>
    "tpu.trace_start"() <{level = 10 : i32, message = "bqk,bkd->bqd"}> : () -> ()
    %cst_26 = arith.constant dense<0.000000e+00> : vector<2x8x8xf32>
    %46 = tpu.matmul %45, %31, %cst_26 {dimension_numbers = #tpu.dot_dimension_numbers<[2], [1], [1], [2], [0, 0, 0, 1, 1, 2], [0], [0]>} : vector<2x8x8xbf16>, vector<2x8x8xbf16>, vector<2x8x8xf32> -> vector<2x8x8xf32>
    "tpu.trace_stop"() : () -> ()
    %47 = vector.shape_cast %46 : vector<2x8x8xf32> to vector<16x8xf32>
    %48 = arith.truncf %47 : vector<16x8xf32> to vector<16x8xbf16>
    %c0_27 = arith.constant 0 : index
    %c0_28 = arith.constant 0 : index
    %c0_29 = arith.constant 0 : index
    %49 = vector.load %arg8[%c0_27, %c0_28, %c0_29] : memref<4x8x32xbf16, #tpu.memory_space<vmem>>, vector<1x8x32xbf16>
    %50 = vector.shape_cast %49 : vector<1x8x32xbf16> to vector<8x32xbf16>
    %cst_30 = arith.constant dense<0.000000e+00> : vector<16x32xf32>
    %51 = tpu.matmul %48, %50, %cst_30 {dimension_numbers = #tpu.dot_dimension_numbers<[1], [0], [0], [1], [0, 0, 1, 1], [], []>} : vector<16x8xbf16>, vector<8x32xbf16>, vector<16x32xf32> -> vector<16x32xf32>
    %52 = arith.addf %28, %51 : vector<16x32xf32>
    %53 = vector.extract_strided_slice %18 {offsets = [0, 0, 8], sizes = [2, 8, 8], strides = [1, 1, 1]} : vector<2x8x32xbf16> to vector<2x8x8xbf16>
    %54 = vector.extract_strided_slice %20 {offsets = [0, 0, 8], sizes = [2, 8, 8], strides = [1, 1, 1]} : vector<2x8x32xbf16> to vector<2x8x8xbf16>
    %55 = vector.extract_strided_slice %22 {offsets = [0, 0, 8], sizes = [2, 8, 8], strides = [1, 1, 1]} : vector<2x8x32xbf16> to vector<2x8x8xbf16>
    "tpu.trace_start"() <{level = 10 : i32, message = "bqd,bkd->bqk"}> : () -> ()
    %cst_31 = arith.constant dense<0.000000e+00> : vector<2x8x8xf32>
    %56 = tpu.matmul %53, %54, %cst_31 {dimension_numbers = #tpu.dot_dimension_numbers<[2], [2], [1], [1], [0, 0, 0, 1, 1, 1], [0], [0]>} : vector<2x8x8xbf16>, vector<2x8x8xbf16>, vector<2x8x8xf32> -> vector<2x8x8xf32>
    %cst_32 = arith.constant -1.76776698E+19 : f32
    "tpu.trace_stop"() : () -> ()
    %57 = vector.broadcast %cst_32 : f32 to vector<2x8x8xf32>
    %58 = arith.select %25, %57, %56 : vector<2x8x8xi1>, vector<2x8x8xf32>
    %cst_33 = arith.constant dense<0xFF800000> : vector<2x8xf32>
    %59 = vector.multi_reduction <maximumf>, %58, %cst_33 [2] : vector<2x8x8xf32> to vector<2x8xf32>
    %60 = vector.shape_cast %59 : vector<2x8xf32> to vector<2x8x1xf32>
    %61 = vector.broadcast %60 : vector<2x8x1xf32> to vector<2x8x8xf32>
    %62 = arith.subf %58, %61 : vector<2x8x8xf32>
    %63 = math.exp %62 : vector<2x8x8xf32>
    %cst_34 = arith.constant dense<0.000000e+00> : vector<2x8xf32>
    %64 = vector.multi_reduction <add>, %63, %cst_34 [2] : vector<2x8x8xf32> to vector<2x8xf32>
    %65 = vector.shape_cast %64 : vector<2x8xf32> to vector<2x8x1xf32>
    %66 = tpu.reciprocal %65 {approx = true} : vector<2x8x1xf32> -> vector<2x8x1xf32>
    %67 = vector.broadcast %66 : vector<2x8x1xf32> to vector<2x8x8xf32>
    %68 = arith.mulf %63, %67 : vector<2x8x8xf32>
    %69 = arith.truncf %68 : vector<2x8x8xf32> to vector<2x8x8xbf16>
    "tpu.trace_start"() <{level = 10 : i32, message = "bqk,bkd->bqd"}> : () -> ()
    %cst_35 = arith.constant dense<0.000000e+00> : vector<2x8x8xf32>
    %70 = tpu.matmul %69, %55, %cst_35 {dimension_numbers = #tpu.dot_dimension_numbers<[2], [1], [1], [2], [0, 0, 0, 1, 1, 2], [0], [0]>} : vector<2x8x8xbf16>, vector<2x8x8xbf16>, vector<2x8x8xf32> -> vector<2x8x8xf32>
    "tpu.trace_stop"() : () -> ()
    %71 = vector.shape_cast %70 : vector<2x8x8xf32> to vector<16x8xf32>
    %72 = arith.truncf %71 : vector<16x8xf32> to vector<16x8xbf16>
    %c1 = arith.constant 1 : index
    %c0_36 = arith.constant 0 : index
    %c0_37 = arith.constant 0 : index
    %73 = vector.load %arg8[%c1, %c0_36, %c0_37] : memref<4x8x32xbf16, #tpu.memory_space<vmem>>, vector<1x8x32xbf16>
    %74 = vector.shape_cast %73 : vector<1x8x32xbf16> to vector<8x32xbf16>
    %cst_38 = arith.constant dense<0.000000e+00> : vector<16x32xf32>
    %75 = tpu.matmul %72, %74, %cst_38 {dimension_numbers = #tpu.dot_dimension_numbers<[1], [0], [0], [1], [0, 0, 1, 1], [], []>} : vector<16x8xbf16>, vector<8x32xbf16>, vector<16x32xf32> -> vector<16x32xf32>
    %76 = arith.addf %52, %75 : vector<16x32xf32>
    %77 = vector.extract_strided_slice %18 {offsets = [0, 0, 16], sizes = [2, 8, 8], strides = [1, 1, 1]} : vector<2x8x32xbf16> to vector<2x8x8xbf16>
    %78 = vector.extract_strided_slice %20 {offsets = [0, 0, 16], sizes = [2, 8, 8], strides = [1, 1, 1]} : vector<2x8x32xbf16> to vector<2x8x8xbf16>
    %79 = vector.extract_strided_slice %22 {offsets = [0, 0, 16], sizes = [2, 8, 8], strides = [1, 1, 1]} : vector<2x8x32xbf16> to vector<2x8x8xbf16>
    "tpu.trace_start"() <{level = 10 : i32, message = "bqd,bkd->bqk"}> : () -> ()
    %cst_39 = arith.constant dense<0.000000e+00> : vector<2x8x8xf32>
    %80 = tpu.matmul %77, %78, %cst_39 {dimension_numbers = #tpu.dot_dimension_numbers<[2], [2], [1], [1], [0, 0, 0, 1, 1, 1], [0], [0]>} : vector<2x8x8xbf16>, vector<2x8x8xbf16>, vector<2x8x8xf32> -> vector<2x8x8xf32>
    %cst_40 = arith.constant -1.76776698E+19 : f32
    "tpu.trace_stop"() : () -> ()
    %81 = vector.broadcast %cst_40 : f32 to vector<2x8x8xf32>
    %82 = arith.select %25, %81, %80 : vector<2x8x8xi1>, vector<2x8x8xf32>
    %cst_41 = arith.constant dense<0xFF800000> : vector<2x8xf32>
    %83 = vector.multi_reduction <maximumf>, %82, %cst_41 [2] : vector<2x8x8xf32> to vector<2x8xf32>
    %84 = vector.shape_cast %83 : vector<2x8xf32> to vector<2x8x1xf32>
    %85 = vector.broadcast %84 : vector<2x8x1xf32> to vector<2x8x8xf32>
    %86 = arith.subf %82, %85 : vector<2x8x8xf32>
    %87 = math.exp %86 : vector<2x8x8xf32>
    %cst_42 = arith.constant dense<0.000000e+00> : vector<2x8xf32>
    %88 = vector.multi_reduction <add>, %87, %cst_42 [2] : vector<2x8x8xf32> to vector<2x8xf32>
    %89 = vector.shape_cast %88 : vector<2x8xf32> to vector<2x8x1xf32>
    %90 = tpu.reciprocal %89 {approx = true} : vector<2x8x1xf32> -> vector<2x8x1xf32>
    %91 = vector.broadcast %90 : vector<2x8x1xf32> to vector<2x8x8xf32>
    %92 = arith.mulf %87, %91 : vector<2x8x8xf32>
    %93 = arith.truncf %92 : vector<2x8x8xf32> to vector<2x8x8xbf16>
    "tpu.trace_start"() <{level = 10 : i32, message = "bqk,bkd->bqd"}> : () -> ()
    %cst_43 = arith.constant dense<0.000000e+00> : vector<2x8x8xf32>
    %94 = tpu.matmul %93, %79, %cst_43 {dimension_numbers = #tpu.dot_dimension_numbers<[2], [1], [1], [2], [0, 0, 0, 1, 1, 2], [0], [0]>} : vector<2x8x8xbf16>, vector<2x8x8xbf16>, vector<2x8x8xf32> -> vector<2x8x8xf32>
    "tpu.trace_stop"() : () -> ()
    %95 = vector.shape_cast %94 : vector<2x8x8xf32> to vector<16x8xf32>
    %96 = arith.truncf %95 : vector<16x8xf32> to vector<16x8xbf16>
    %c2 = arith.constant 2 : index
    %c0_44 = arith.constant 0 : index
    %c0_45 = arith.constant 0 : index
    %97 = vector.load %arg8[%c2, %c0_44, %c0_45] : memref<4x8x32xbf16, #tpu.memory_space<vmem>>, vector<1x8x32xbf16>
    %98 = vector.shape_cast %97 : vector<1x8x32xbf16> to vector<8x32xbf16>
    %cst_46 = arith.constant dense<0.000000e+00> : vector<16x32xf32>
    %99 = tpu.matmul %96, %98, %cst_46 {dimension_numbers = #tpu.dot_dimension_numbers<[1], [0], [0], [1], [0, 0, 1, 1], [], []>} : vector<16x8xbf16>, vector<8x32xbf16>, vector<16x32xf32> -> vector<16x32xf32>
    %100 = arith.addf %76, %99 : vector<16x32xf32>
    %101 = vector.extract_strided_slice %18 {offsets = [0, 0, 24], sizes = [2, 8, 8], strides = [1, 1, 1]} : vector<2x8x32xbf16> to vector<2x8x8xbf16>
    %102 = vector.extract_strided_slice %20 {offsets = [0, 0, 24], sizes = [2, 8, 8], strides = [1, 1, 1]} : vector<2x8x32xbf16> to vector<2x8x8xbf16>
    %103 = vector.extract_strided_slice %22 {offsets = [0, 0, 24], sizes = [2, 8, 8], strides = [1, 1, 1]} : vector<2x8x32xbf16> to vector<2x8x8xbf16>
    "tpu.trace_start"() <{level = 10 : i32, message = "bqd,bkd->bqk"}> : () -> ()
    %cst_47 = arith.constant dense<0.000000e+00> : vector<2x8x8xf32>
    %104 = tpu.matmul %101, %102, %cst_47 {dimension_numbers = #tpu.dot_dimension_numbers<[2], [2], [1], [1], [0, 0, 0, 1, 1, 1], [0], [0]>} : vector<2x8x8xbf16>, vector<2x8x8xbf16>, vector<2x8x8xf32> -> vector<2x8x8xf32>
    %cst_48 = arith.constant -1.76776698E+19 : f32
    "tpu.trace_stop"() : () -> ()
    %105 = vector.broadcast %cst_48 : f32 to vector<2x8x8xf32>
    %106 = arith.select %25, %105, %104 : vector<2x8x8xi1>, vector<2x8x8xf32>
    %cst_49 = arith.constant dense<0xFF800000> : vector<2x8xf32>
    %107 = vector.multi_reduction <maximumf>, %106, %cst_49 [2] : vector<2x8x8xf32> to vector<2x8xf32>
    %108 = vector.shape_cast %107 : vector<2x8xf32> to vector<2x8x1xf32>
    %109 = vector.broadcast %108 : vector<2x8x1xf32> to vector<2x8x8xf32>
    %110 = arith.subf %106, %109 : vector<2x8x8xf32>
    %111 = math.exp %110 : vector<2x8x8xf32>
    %cst_50 = arith.constant dense<0.000000e+00> : vector<2x8xf32>
    %112 = vector.multi_reduction <add>, %111, %cst_50 [2] : vector<2x8x8xf32> to vector<2x8xf32>
    %113 = vector.shape_cast %112 : vector<2x8xf32> to vector<2x8x1xf32>
    %114 = tpu.reciprocal %113 {approx = true} : vector<2x8x1xf32> -> vector<2x8x1xf32>
    %115 = vector.broadcast %114 : vector<2x8x1xf32> to vector<2x8x8xf32>
    %116 = arith.mulf %111, %115 : vector<2x8x8xf32>
    %117 = arith.truncf %116 : vector<2x8x8xf32> to vector<2x8x8xbf16>
    "tpu.trace_start"() <{level = 10 : i32, message = "bqk,bkd->bqd"}> : () -> ()
    %cst_51 = arith.constant dense<0.000000e+00> : vector<2x8x8xf32>
    %118 = tpu.matmul %117, %103, %cst_51 {dimension_numbers = #tpu.dot_dimension_numbers<[2], [1], [1], [2], [0, 0, 0, 1, 1, 2], [0], [0]>} : vector<2x8x8xbf16>, vector<2x8x8xbf16>, vector<2x8x8xf32> -> vector<2x8x8xf32>
    "tpu.trace_stop"() : () -> ()
    %119 = vector.shape_cast %118 : vector<2x8x8xf32> to vector<16x8xf32>
    %120 = arith.truncf %119 : vector<16x8xf32> to vector<16x8xbf16>
    %c3 = arith.constant 3 : index
    %c0_52 = arith.constant 0 : index
    %c0_53 = arith.constant 0 : index
    %121 = vector.load %arg8[%c3, %c0_52, %c0_53] : memref<4x8x32xbf16, #tpu.memory_space<vmem>>, vector<1x8x32xbf16>
    %122 = vector.shape_cast %121 : vector<1x8x32xbf16> to vector<8x32xbf16>
    %cst_54 = arith.constant dense<0.000000e+00> : vector<16x32xf32>
    %123 = tpu.matmul %120, %122, %cst_54 {dimension_numbers = #tpu.dot_dimension_numbers<[1], [0], [0], [1], [0, 0, 1, 1], [], []>} : vector<16x8xbf16>, vector<8x32xbf16>, vector<16x32xf32> -> vector<16x32xf32>
    %124 = arith.addf %100, %123 : vector<16x32xf32>
    %125 = arith.addf %124, %1 : vector<16x32xf32>
    %c0_55 = arith.constant 0 : index
    %c0_56 = arith.constant 0 : index
    %126 = vector.load %arg10[%c0_55, %c0_56] : memref<1x32xf32, #tpu.memory_space<vmem>>, vector<1x32xf32>
    %c0_57 = arith.constant 0 : index
    %c0_58 = arith.constant 0 : index
    %127 = vector.load %arg11[%c0_57, %c0_58] : memref<1x32xf32, #tpu.memory_space<vmem>>, vector<1x32xf32>
    %cst_59 = arith.constant dense<0.000000e+00> : vector<16xf32>
    %128 = vector.multi_reduction <add>, %125, %cst_59 [1] : vector<16x32xf32> to vector<16xf32>
    %129 = vector.shape_cast %128 : vector<16xf32> to vector<16x1xf32>
    %cst_60 = arith.constant 3.200000e+01 : f32
    %130 = vector.broadcast %cst_60 : f32 to vector<16x1xf32>
    %131 = arith.divf %129, %130 : vector<16x1xf32>
    %132 = vector.broadcast %131 : vector<16x1xf32> to vector<16x32xf32>
    %133 = arith.subf %125, %132 : vector<16x32xf32>
    %134 = arith.mulf %133, %133 : vector<16x32xf32>
    %cst_61 = arith.constant dense<0.000000e+00> : vector<16xf32>
    %135 = vector.multi_reduction <add>, %134, %cst_61 [1] : vector<16x32xf32> to vector<16xf32>
    %136 = vector.shape_cast %135 : vector<16xf32> to vector<16x1xf32>
    %cst_62 = arith.constant 3.200000e+01 : f32
    %137 = vector.broadcast %cst_62 : f32 to vector<16x1xf32>
    %138 = arith.divf %136, %137 : vector<16x1xf32>
    %139 = vector.broadcast %131 : vector<16x1xf32> to vector<16x32xf32>
    %140 = arith.subf %125, %139 : vector<16x32xf32>
    %cst_63 = arith.constant 9.99999974E-6 : f32
    %141 = vector.broadcast %cst_63 : f32 to vector<16x1xf32>
    %142 = arith.addf %138, %141 : vector<16x1xf32>
    %143 = math.rsqrt %142 : vector<16x1xf32>
    %144 = vector.broadcast %143 : vector<16x1xf32> to vector<16x32xf32>
    %145 = arith.mulf %140, %144 : vector<16x32xf32>
    %146 = vector.broadcast %126 : vector<1x32xf32> to vector<16x32xf32>
    %147 = arith.mulf %145, %146 : vector<16x32xf32>
    %148 = vector.broadcast %127 : vector<1x32xf32> to vector<16x32xf32>
    %149 = arith.addf %147, %148 : vector<16x32xf32>
    %150 = arith.truncf %149 : vector<16x32xf32> to vector<16x32xbf16>
    %c0_64 = arith.constant 0 : index
    %c0_65 = arith.constant 0 : index
    %151 = vector.load %arg14[%c0_64, %c0_65] : memref<32x128xbf16, #tpu.memory_space<vmem>>, vector<32x128xbf16>
    %cst_66 = arith.constant dense<0.000000e+00> : vector<16x128xf32>
    %152 = tpu.matmul %150, %151, %cst_66 {dimension_numbers = #tpu.dot_dimension_numbers<[1], [0], [0], [1], [0, 0, 1, 1], [], []>} : vector<16x32xbf16>, vector<32x128xbf16>, vector<16x128xf32> -> vector<16x128xf32>
    %c0_67 = arith.constant 0 : index
    %c0_68 = arith.constant 0 : index
    %153 = vector.load %arg15[%c0_67, %c0_68] : memref<1x128xf32, #tpu.memory_space<vmem>>, vector<1x128xf32>
    %154 = vector.broadcast %153 : vector<1x128xf32> to vector<16x128xf32>
    %155 = arith.addf %152, %154 : vector<16x128xf32>
    %cst_69 = arith.constant 0.000000e+00 : f32
    %156 = vector.broadcast %cst_69 : f32 to vector<16x128xf32>
    %157 = arith.maximumf %155, %156 : vector<16x128xf32>
    %158 = arith.truncf %157 : vector<16x128xf32> to vector<16x128xbf16>
    %c0_70 = arith.constant 0 : index
    %c0_71 = arith.constant 0 : index
    %159 = vector.load %arg16[%c0_70, %c0_71] : memref<128x32xbf16, #tpu.memory_space<vmem>>, vector<128x32xbf16>
    %cst_72 = arith.constant dense<0.000000e+00> : vector<16x32xf32>
    %160 = tpu.matmul %158, %159, %cst_72 {dimension_numbers = #tpu.dot_dimension_numbers<[1], [0], [0], [1], [0, 0, 1, 1], [], []>} : vector<16x128xbf16>, vector<128x32xbf16>, vector<16x32xf32> -> vector<16x32xf32>
    %c0_73 = arith.constant 0 : index
    %c0_74 = arith.constant 0 : index
    %161 = vector.load %arg17[%c0_73, %c0_74] : memref<1x32xf32, #tpu.memory_space<vmem>>, vector<1x32xf32>
    %162 = vector.broadcast %161 : vector<1x32xf32> to vector<16x32xf32>
    %163 = arith.addf %160, %162 : vector<16x32xf32>
    %164 = arith.addf %163, %149 : vector<16x32xf32>
    %c0_75 = arith.constant 0 : index
    %c0_76 = arith.constant 0 : index
    %165 = vector.load %arg12[%c0_75, %c0_76] : memref<1x32xf32, #tpu.memory_space<vmem>>, vector<1x32xf32>
    %c0_77 = arith.constant 0 : index
    %c0_78 = arith.constant 0 : index
    %166 = vector.load %arg13[%c0_77, %c0_78] : memref<1x32xf32, #tpu.memory_space<vmem>>, vector<1x32xf32>
    %cst_79 = arith.constant dense<0.000000e+00> : vector<16xf32>
    %167 = vector.multi_reduction <add>, %164, %cst_79 [1] : vector<16x32xf32> to vector<16xf32>
    %168 = vector.shape_cast %167 : vector<16xf32> to vector<16x1xf32>
    %cst_80 = arith.constant 3.200000e+01 : f32
    %169 = vector.broadcast %cst_80 : f32 to vector<16x1xf32>
    %170 = arith.divf %168, %169 : vector<16x1xf32>
    %171 = vector.broadcast %170 : vector<16x1xf32> to vector<16x32xf32>
    %172 = arith.subf %164, %171 : vector<16x32xf32>
    %173 = arith.mulf %172, %172 : vector<16x32xf32>
    %cst_81 = arith.constant dense<0.000000e+00> : vector<16xf32>
    %174 = vector.multi_reduction <add>, %173, %cst_81 [1] : vector<16x32xf32> to vector<16xf32>
    %175 = vector.shape_cast %174 : vector<16xf32> to vector<16x1xf32>
    %cst_82 = arith.constant 3.200000e+01 : f32
    %176 = vector.broadcast %cst_82 : f32 to vector<16x1xf32>
    %177 = arith.divf %175, %176 : vector<16x1xf32>
    %178 = vector.broadcast %170 : vector<16x1xf32> to vector<16x32xf32>
    %179 = arith.subf %164, %178 : vector<16x32xf32>
    %cst_83 = arith.constant 9.99999974E-6 : f32
    %180 = vector.broadcast %cst_83 : f32 to vector<16x1xf32>
    %181 = arith.addf %177, %180 : vector<16x1xf32>
    %182 = math.rsqrt %181 : vector<16x1xf32>
    %183 = vector.broadcast %182 : vector<16x1xf32> to vector<16x32xf32>
    %184 = arith.mulf %179, %183 : vector<16x32xf32>
    %185 = vector.broadcast %165 : vector<1x32xf32> to vector<16x32xf32>
    %186 = arith.mulf %184, %185 : vector<16x32xf32>
    %187 = vector.broadcast %166 : vector<1x32xf32> to vector<16x32xf32>
    %188 = arith.addf %186, %187 : vector<16x32xf32>
    %189 = vector.shape_cast %188 : vector<16x32xf32> to vector<2x8x32xf32>
    %c0_84 = arith.constant 0 : index
    %c0_85 = arith.constant 0 : index
    %c0_86 = arith.constant 0 : index
    %190 = vector.load %arg18[%c0_84, %c0_85, %c0_86] : memref<2x8x32xf32, #tpu.memory_space<vmem>>, vector<2x8x32xf32>
    tpu.vector_store %arg18[%c0_84, %c0_85, %c0_86], %189 {strides = array<i32>} : memref<2x8x32xf32, #tpu.memory_space<vmem>>, vector<2x8x32xf32>,
    return
  }
  func.func @transform_0(%arg0: i32) -> (i32, i32, i32) {
    %c0_i32 = arith.constant 0 : i32
    %c0_i32_0 = arith.constant 0 : i32
    %c0_i32_1 = arith.constant 0 : i32
    return %arg0, %c0_i32, %c0_i32_0 : i32, i32, i32
  }
  func.func @transform_1(%arg0: i32) -> (i32, i32, i32) {
    %c0_i32 = arith.constant 0 : i32
    %c0_i32_0 = arith.constant 0 : i32
    %c0_i32_1 = arith.constant 0 : i32
    return %arg0, %c0_i32, %c0_i32_0 : i32, i32, i32
  }
  func.func @transform_2(%arg0: i32) -> (i32, i32, i32) {
    %c0_i32 = arith.constant 0 : i32
    %c0_i32_0 = arith.constant 0 : i32
    %c0_i32_1 = arith.constant 0 : i32
    return %arg0, %c0_i32, %c0_i32_0 : i32, i32, i32
  }
  func.func @transform_3(%arg0: i32) -> (i32, i32, i32) {
    %c0_i32 = arith.constant 0 : i32
    %c0_i32_0 = arith.constant 0 : i32
    %c0_i32_1 = arith.constant 0 : i32
    return %arg0, %c0_i32, %c0_i32_0 : i32, i32, i32
  }
  func.func @transform_4(%arg0: i32) -> (i32, i32) {
    %c0_i32 = arith.constant 0 : i32
    %c0_i32_0 = arith.constant 0 : i32
    %c0_i32_1 = arith.constant 0 : i32
    return %c0_i32, %c0_i32_0 : i32, i32
  }
  func.func @transform_5(%arg0: i32) -> (i32, i32) {
    %c0_i32 = arith.constant 0 : i32
    %c0_i32_0 = arith.constant 0 : i32
    %c0_i32_1 = arith.constant 0 : i32
    return %c0_i32, %c0_i32_0 : i32, i32
  }
  func.func @transform_6(%arg0: i32) -> (i32, i32) {
    %c0_i32 = arith.constant 0 : i32
    %c0_i32_0 = arith.constant 0 : i32
    %c0_i32_1 = arith.constant 0 : i32
    return %c0_i32, %c0_i32_0 : i32, i32
  }
  func.func @transform_7(%arg0: i32) -> (i32, i32, i32) {
    %c0_i32 = arith.constant 0 : i32
    %c0_i32_0 = arith.constant 0 : i32
    %c0_i32_1 = arith.constant 0 : i32
    %c0_i32_2 = arith.constant 0 : i32
    return %c0_i32, %c0_i32_0, %c0_i32_1 : i32, i32, i32
  }
  func.func @transform_8(%arg0: i32) -> (i32, i32) {
    %c0_i32 = arith.constant 0 : i32
    %c0_i32_0 = arith.constant 0 : i32
    %c0_i32_1 = arith.constant 0 : i32
    return %c0_i32, %c0_i32_0 : i32, i32
  }
  func.func @transform_9(%arg0: i32) -> (i32, i32) {
    %c0_i32 = arith.constant 0 : i32
    %c0_i32_0 = arith.constant 0 : i32
    %c0_i32_1 = arith.constant 0 : i32
    return %c0_i32, %c0_i32_0 : i32, i32
  }
  func.func @transform_10(%arg0: i32) -> (i32, i32) {
    %c0_i32 = arith.constant 0 : i32
    %c0_i32_0 = arith.constant 0 : i32
    %c0_i32_1 = arith.constant 0 : i32
    return %c0_i32, %c0_i32_0 : i32, i32
  }
  func.func @transform_11(%arg0: i32) -> (i32, i32) {
    %c0_i32 = arith.constant 0 : i32
    %c0_i32_0 = arith.constant 0 : i32
    %c0_i32_1 = arith.constant 0 : i32
    return %c0_i32, %c0_i32_0 : i32, i32
  }
  func.func @transform_12(%arg0: i32) -> (i32, i32) {
    %c0_i32 = arith.constant 0 : i32
    %c0_i32_0 = arith.constant 0 : i32
    %c0_i32_1 = arith.constant 0 : i32
    return %c0_i32, %c0_i32_0 : i32, i32
  }
  func.func @transform_13(%arg0: i32) -> (i32, i32) {
    %c0_i32 = arith.constant 0 : i32
    %c0_i32_0 = arith.constant 0 : i32
    %c0_i32_1 = arith.constant 0 : i32
    return %c0_i32, %c0_i32_0 : i32, i32
  }
  func.func @transform_14(%arg0: i32) -> (i32, i32) {
    %c0_i32 = arith.constant 0 : i32
    %c0_i32_0 = arith.constant 0 : i32
    %c0_i32_1 = arith.constant 0 : i32
    return %c0_i32, %c0_i32_0 : i32, i32
  }
  func.func @transform_15(%arg0: i32) -> (i32, i32) {
    %c0_i32 = arith.constant 0 : i32
    %c0_i32_0 = arith.constant 0 : i32
    %c0_i32_1 = arith.constant 0 : i32
    return %c0_i32, %c0_i32_0 : i32, i32
  }
  func.func @transform_16(%arg0: i32) -> (i32, i32) {
    %c0_i32 = arith.constant 0 : i32
    %c0_i32_0 = arith.constant 0 : i32
    %c0_i32_1 = arith.constant 0 : i32
    return %c0_i32, %c0_i32_0 : i32, i32
  }
  func.func @transform_17(%arg0: i32) -> (i32, i32, i32) {
    %c0_i32 = arith.constant 0 : i32
    %c0_i32_0 = arith.constant 0 : i32
    %c0_i32_1 = arith.constant 0 : i32
    return %arg0, %c0_i32, %c0_i32_0 : i32, i32, i32
  }
}

</mosaic_0001>

<bundles_post_ra>
// kernel: tpu_custom_call.1
= control target key start
LH: loop header
LB: loop body
LE: loop exit
PB: predicated region body
PF: predicated region fallthrough
CT: control target
= control target key end

     0   :  { %s2638_s0 = inlined_call_operand.vmem [shape: f32[2,8,32], index: 0, kind: input, shape index: {}]   ;;  %s2639_s1 = inlined_call_operand.vmem [shape: f32[2,8,32], index: 1, kind: input, shape index: {}]   ;;  %s2640_s2 = inlined_call_operand.vmem [shape: f32[2,8,32], index: 2, kind: input, shape index: {}]   ;;  %s2641_s3 = inlined_call_operand.vmem [shape: s32[2,8,8], index: 3, kind: input, shape index: {}]   ;;  %s2642_s4 = inlined_call_operand.vmem [shape: bf16[32,32], index: 4, kind: input, shape index: {}]   ;;  %s2643_s5 = inlined_call_operand.hbm [shape: bf16[32,32], index: 5, kind: input, shape index: {}]   ;;  %s2644_s6 = inlined_call_operand.hbm [shape: bf16[32,32], index: 6, kind: input, shape index: {}]   ;;  %s2645_s7 = inlined_call_operand.hbm [shape: bf16[4,8,32], index: 7, kind: input, shape index: {}]   ;;  %s2646_s8 = inlined_call_operand.vmem [shape: f32[1,32], index: 8, kind: input, shape index: {}]   ;;  %s2647_s9 = inlined_call_operand.vmem [shape: f32[1,32], index: 9, kind: input, shape index: {}]   ;;  %s2648_s10 = inlined_call_operand.vmem [shape: f32[1,32], index: 10, kind: input, shape index: {}]   ;;  %s2649_s11 = inlined_call_operand.vmem [shape: f32[1,32], index: 11, kind: input, shape index: {}]   ;;  %s2650_s12 = inlined_call_operand.vmem [shape: f32[1,32], index: 12, kind: input, shape index: {}]   ;;  %s2651_s13 = inlined_call_operand.vmem [shape: bf16[32,128], index: 13, kind: input, shape index: {}]   ;;  %s2652_s14 = inlined_call_operand.vmem [shape: f32[1,128], index: 14, kind: input, shape index: {}]   ;;  %s2653_s15 = inlined_call_operand.vmem [shape: bf16[128,32], index: 15, kind: input, shape index: {}]   ;;  %s2654_s16 = inlined_call_operand.vmem [shape: f32[1,32], index: 16, kind: input, shape index: {}]   ;;  %s2655_s17 = inlined_call_operand.hbm [shape: f32[2,8,32], index: 17, kind: output, shape index: {}]  }
   0x1   :  { %2658 = sst [smem:[#allocation12_spill]] %s2638_s0 }
   0x2   :  { %2659 = sst [smem:[#allocation13_spill]] %s2639_s1 }
   0x3   :  { %22 = vsyncpa [#allocation3], 0 }
   0x4   :  { %23 = vsyncpa [#allocation6], 0 }
   0x5   :  { %24 = vsyncpa [#allocation4], 0  ;;  %s2138_s24 = smov [#allocation5]   ;;  %s2139_s26 = smov [#allocation2]  }
   0x6   :  { %s52_s25 = sshll.u32 %s2138_s24, 4  ;;  %s40_s27 = sshll.u32 %s2139_s26, 4  ;;  %s53_s25 = int_to_ptr.vmem [resolvable:$true] %s52_s25  ;;  %s2241_s27 = int_to_ptr.vmem [resolvable:$true] %s40_s27 }
   0x7   :  { %s2044_s0 = scalar_lea.hbm %s2644_s6, 256 }
   0x8   :  { %p2045_p0 = scmp.ne.s32.totalorder %s2644_s6, %s2044_s0  ;;  %p2048_p1 = scmp.lt.u32.totalorder %s2044_s0, %s2644_s6 }
   0xa   :  { %p2050_p2 = pnand %p2048_p1, %p2045_p0 }
   0xc   :  { %2053 = shalt.err (!%p2050_p2)
}
   0xd   :  { %s2054_s20 = scalar_lea.vmem %s53_s25, 256  ;;  %p2059_p4 = scmp.lt.s32.totalorder %s53_s25, %s53_s25 }
   0xe   :  { %p2055_p3 = scmp.ne.s32.totalorder %s53_s25, %s2054_s20  ;;  %p2060_p5 = scmp.lt.s32.totalorder %s2054_s20, %s2054_s20 }
  0x10   :  { %p2061_p6 = por %p2060_p5, %p2059_p4 }
  0x12   :  { %p2062_p7 = pnand %p2061_p6, %p2055_p3 }
  0x14   :  { %2065 = shalt.err (!%p2062_p7)
}
  0x15   :  { %s2140_s21 = smov 64   ;;  %s2141_s22 = smov 4  }
  0x16   :  { %58 = dma.hbm_to_vmem [thread:$0]  %s2644_s6, 256, %s53_s25, [#allocation6], %s2140_s21, %s2140_s21, %s2141_s22  }
  0x17   :  { %s2066_s29 = scalar_lea.hbm %s2643_s5, 256 }
  0x18   :  { %p2067_p8 = scmp.ne.s32.totalorder %s2643_s5, %s2066_s29  ;;  %p2070_p9 = scmp.lt.u32.totalorder %s2066_s29, %s2643_s5 }
  0x1a   :  { %p2072_p10 = pnand %p2070_p9, %p2067_p8 }
  0x1c   :  { %2075 = shalt.err (!%p2072_p10)
}
  0x1d   :  { %s2076_s1 = scalar_lea.vmem %s2241_s27, 256  ;;  %p2081_p12 = scmp.lt.s32.totalorder %s2241_s27, %s2241_s27 }
  0x1e   :  { %p2077_p11 = scmp.ne.s32.totalorder %s2241_s27, %s2076_s1  ;;  %p2082_p13 = scmp.lt.s32.totalorder %s2076_s1, %s2076_s1 }
  0x20   :  { %p2083_p0 = por %p2082_p13, %p2081_p12 }
  0x22   :  { %p2084_p1 = pnand %p2083_p0, %p2077_p11 }
  0x24   :  { %2087 = shalt.err (!%p2084_p1)
}
  0x25   :  { %46 = dma.hbm_to_vmem [thread:$0]  %s2643_s5, 256, %s2241_s27, [#allocation3], %s2140_s21, %s2140_s21, %s2141_s22  }
  0x26   :  { %s2142_s20 = smov [#allocation7]   ;;  %s2088_s28 = scalar_lea.hbm %s2645_s7, 256 }
  0x27   :  { %s64_s23 = sshll.u32 %s2142_s20, 4  ;;  %p2089_p2 = scmp.ne.s32.totalorder %s2645_s7, %s2088_s28  ;;  %s65_s23 = int_to_ptr.vmem [resolvable:$true] %s64_s23 }
  0x28   :  { %p2092_p3 = scmp.lt.u32.totalorder %s2088_s28, %s2645_s7 }
  0x2a   :  { %p2094_p4 = pnand %p2092_p3, %p2089_p2 }
  0x2c   :  { %2097 = shalt.err (!%p2094_p4)
}
  0x2d   :  { %s2098_s19 = scalar_lea.vmem %s65_s23, 256  ;;  %p2103_p6 = scmp.lt.s32.totalorder %s65_s23, %s65_s23 }
  0x2e   :  { %p2099_p5 = scmp.ne.s32.totalorder %s65_s23, %s2098_s19  ;;  %p2104_p7 = scmp.lt.s32.totalorder %s2098_s19, %s2098_s19 }
  0x30   :  { %p2105_p8 = por %p2104_p7, %p2103_p6 }
  0x32   :  { %p2106_p9 = pnand %p2105_p8, %p2099_p5 }
  0x34   :  { %2109 = shalt.err (!%p2106_p9)
}
  0x35   :  { %70 = dma.hbm_to_vmem [thread:$0]  %s2645_s7, 256, %s65_s23, [#allocation6], %s2140_s21, %s2140_s21, %s2141_s22  }
  0x36   :  { %2132 = dma.done.wait [#allocation3], 256  }
  0x37   :  { %2133 = vsyncadd [#allocation3], 4294967040 }
  0x38   :  { %2134 = dma.done.wait [#allocation6], 512  }
  0x39   :  { %2135 = vsyncadd [#allocation6], 4294966784  ;;  %v2143_v0 = vmov 0.0   ;;  %vm2144_vm0 = vmmov 0   ;;  %v1988_v1 = vld [vmem:[#allocation5] sm:$0xff]   ;;  %v1989_v2 = vld [vmem:[#allocation5 + $0x8] sm:$0xff]  }
  0x3a   :  { %1803 = vmatprep.subr.bf16.mxu1 %v2143_v0  ;;  %1807 = vmatprep.mubr.msk.bf16.mxu1 %vm2144_vm0, %v2143_v0  ;;  %v2302_v3 = vld [vmem:[%s2640_s2] sm:$0xff]  ;;  %v2307_v4 = vld [vmem:[%s2640_s2 + $0x8] sm:$0xff]  ;;  %vm124_vm1 = vcmask 261120   ;;  %s2660_s20 = sld [smem:[#allocation13_spill]]  ;;  %s2661_s18 = sld [smem:[#allocation12_spill]]  ;;  %vm308_vm2 = vcmask 64512  }
  0x3b   :  { %1833 = vmatprep.subr.bf16.mxu0 %v2143_v0  ;;  %1835 = vmatprep.mubr.msk.bf16.mxu0 %vm2144_vm0, %v2143_v0  ;;  %v105_v5 = vmul.f32 0.17677669, %v2302_v3  ;;  %v106_v6 = vmul.f32 0.17677669, %v2307_v4  ;;  %v1990_v8 = vld [vmem:[#allocation2] sm:$0xff]   ;;  %v1991_v9 = vld [vmem:[#allocation2 + $0x8] sm:$0xff]  }
  0x3c   :  { %1804 = vmatpush3.bf16.msra.mxu1 %v1988_v1  ;;  %v1992_v13 = vld [vmem:[%s2642_s4] sm:$0xff]   ;;  %v1993_v14 = vld [vmem:[%s2642_s4 + $0x8] sm:$0xff]   ;;  %vm430_vm3 = vcmask 1043456   ;;  %s2146_s22 = smov 112   ;;  %s2148_s24 = smov [#allocation8]  }
  0x3d   :  { %1805 = vmatprep.subr.bf16.mxu1 %v2143_v0  ;;  %v107_v7 = vpack.c.bf16 %v106_v6, %v105_v5  ;;  %v2379_v40 = vld [vmem:[%s2641_s3] sm:$0xff]  ;;  %v2384_v41 = vld [vmem:[%s2641_s3 + $0x8] sm:$0xff]  ;;  %s2145_s3 = smov 120   ;;  %s1682_s26 = sshll.u32 %s2148_s24, 4  ;;  %s1683_s26 = int_to_ptr.vmem [resolvable:$true] %s1682_s26 }
  0x3e   :  { %vm299_vm4 = vcmp.eq.s32.totalorder %v2379_v40, 0  ;;  %vm300_vm5 = vcmp.eq.s32.totalorder %v2384_v41, 0  ;;  %v521_v6 = vld [vmem:[#allocation7] sm:$0xf]  ;;  %s2110_s28 = scalar_lea.vmem %s1683_s26, 256  ;;  %p2115_p11 = scmp.lt.s32.totalorder %s1683_s26, %s1683_s26 }
  0x3f   :  { %p2111_p10 = scmp.ne.s32.totalorder %s1683_s26, %s2110_s28  ;;  %p2116_p12 = scmp.lt.s32.totalorder %s2110_s28, %s2110_s28 }
  0x40   :  { %1806 = vmatpush3.bf16.msra.mxu1 %v1989_v2  ;;  %v101_v10 = vld [vmem:[%s2660_s20] sm:$0xff]  ;;  %v102_v11 = vld [vmem:[%s2660_s20 + $0x8] sm:$0xff] }
  0x41   :  { %1811 = vmatprep.subr.bf16.mxu1 %v2143_v0  ;;  %v169_v12 = vpack.c.bf16 %v102_v11, %v101_v10  ;;  %v103_v15 = vld [vmem:[%s2661_s18] sm:$0xff]  ;;  %v104_v16 = vld [vmem:[%s2661_s18 + $0x8] sm:$0xff]  ;;  %p2117_p13 = por %p2116_p12, %p2115_p11 }
  0x42   :  { %v230_v17 = vpack.c.bf16 %v104_v16, %v103_v15 }
  0x43   :  { %1808 = vmatmul.mubr.msk.bf16.vlgmr.msra.gmra.mrb[0].mxu1 %vm124_vm1, %v107_v7  ;;  %p2118_p0 = pnand %p2117_p13, %p2111_p10 }
  0x44   :  { %1812 = vmatpush3.bf16.msra.mxu1 %v1990_v8  ;;  %1815 = vmatprep.mubr.msk.bf16.mxu1 %vm2144_vm0, %v2143_v0 }
  0x45   :  { %1813 = vmatprep.subr.bf16.mxu1 %v2143_v0 }
  0x48   :  { %1814 = vmatpush3.bf16.msra.mxu1 %v1991_v9  ;;  %v526_v9 = vsel %vm430_vm3, %v521_v6, 0 }
  0x49   :  { %1819 = vmatprep.subr.bf16.mxu1 %v2143_v0 }
  0x4b   :  { %1816 = vmatmul.mubr.msk.bf16.vlgmr.msra.gmra.mrb[4].mxu1 %vm124_vm1, %v169_v12 }
  0x4c   :  { %1820 = vmatpush3.bf16.msra.mxu1 %v1992_v13  ;;  %1823 = vmatprep.mubr.msk.bf16.mxu1 %vm2144_vm0, %v2143_v0 }
  0x4d   :  { %1821 = vmatprep.subr.bf16.mxu1 %v2143_v0 }
  0x50   :  { %1822 = vmatpush3.bf16.msra.mxu1 %v1993_v14 }
  0x51   :  { %1827 = vmatprep.subr.bf16.mxu1 %v2143_v0 }
  0x53   :  { %1824 = vmatmul.mubr.msk.bf16.vlgmr.msra.gmra.mrb[8].mxu1 %vm124_vm1, %v230_v17 }
  0x54   :  { %1829 = vmatprep.mubr.msk.bf16.mxu1 %vm2144_vm0, %v2143_v0 }
 0x116   :  { %v162_v18 = vpop.f32.mrb[0].mxu1 }
 0x117   :  { %v1809_v19 = vpop.f32.mrb[1].mxu1  ;;  %v2354_v30 = vpack.c.bf16 %v162_v18, %v162_v18 }
 0x118   :  { %v165_v20 = vpop.f32.mrb[2].mxu1 }
 0x119   :  { %v1810_v21 = vpop.f32.mrb[3].mxu1  ;;  %v2356_v31 = vpack.c.bf16 %v165_v20, %v165_v20 }
 0x11e   :  { %v223_v22 = vpop.f32.mrb[4].mxu1 }
 0x11f   :  { %v2344_v23 = vpack.c.bf16 %v223_v22, %v223_v22  ;;  %v1817_v24 = vpop.f32.mrb[5].mxu1 }
 0x120   :  { %v226_v25 = vpop.f32.mrb[6].mxu1 }
 0x121   :  { %v2346_v26 = vpack.c.bf16 %v226_v25, %v226_v25  ;;  %v1818_v27 = vpop.f32.mrb[7].mxu1  ;;  %v313_v28 = vsel %vm308_vm2, %v2344_v23, 0 }
 0x122   :  { %1828 = vmatpush3.bf16.xpose.msra.mxu1 %v313_v28 }
 0x123   :  { %v359_v29 = vsel %vm308_vm2, %v2346_v26, 0  ;;  %1839 = vmatprep.subr.bf16.mxu1 %v2143_v0 }
 0x124   :  { %1834 = vmatpush3.bf16.xpose.msra.mxu0 %v359_v29 }
 0x125   :  { %1845 = vmatprep.subr.bf16.mxu0 %v2143_v0 }
 0x126   :  { %v284_v32 = vpop.f32.mrb[8].mxu1 }
 0x127   :  { %v2366_v33 = vpack.c.bf16 %v284_v32, %v284_v32  ;;  %v1825_v34 = vpop.f32.mrb[9].mxu1 }
 0x128   :  { %v287_v35 = vpop.f32.mrb[10].mxu1 }
 0x129   :  { %1830 = vmatmul.mubr.msk.bf16.vlgmr.msra.gmra.mrb[12].mxu1 %vm308_vm2, %v2354_v30  ;;  %v2368_v36 = vpack.c.bf16 %v287_v35, %v287_v35  ;;  %v1826_v37 = vpop.f32.mrb[11].mxu1  ;;  %v432_v38 = vsel %vm430_vm3, %v2366_v33, 0 }
 0x12a   :  { %1841 = vmatprep.mubr.msk.bf16.mxu1 %vm2144_vm0, %v2143_v0  ;;  %1840 = vmatpush3.bf16.msra.mxu1 %v432_v38 }
 0x12b   :  { %1836 = vmatmul.mubr.msk.bf16.vlgmr.msra.gmra.mrb[0].mxu0 %vm308_vm2, %v2356_v31  ;;  %v478_v39 = vsel %vm430_vm3, %v2368_v36, 0  ;;  %1851 = vmatprep.subr.bf16.mxu1 %v2143_v0 }
 0x12c   :  { %1847 = vmatprep.mubr.msk.bf16.mxu0 %vm2144_vm0, %v2143_v0  ;;  %1846 = vmatpush3.bf16.msra.mxu0 %v478_v39 }
 0x12d   :  { %1857 = vmatprep.subr.bf16.mxu0 %v2143_v0 }
 0x1fc   :  { %v349_v42 = vpop.f32.mrb[12].mxu1 }
 0x1fd   :  { %v401_v43 = vsel %vm299_vm4, -1.767767e+19, %v349_v42  ;;  %v1831_v44 = vpop.f32.mrb[13].mxu1 }
 0x1fe   :  { %v352_v45 = vpop.f32.mrb[14].mxu1  ;;  %v395_v46 = vpop.f32.mrb[0].mxu0  ;;  %v403_v47 = vsel %vm308_vm2, %v401_v43, -inf }
 0x1ff   :  { %v402_v48 = vsel %vm300_vm5, -1.767767e+19, %v395_v46  ;;  %v1837_v49 = vpop.f32.mrb[1].mxu0  ;;  %404 = vmax.xlane.f32.xlu0 %v403_v47  ;;  %v1832_v50 = vpop.f32.mrb[15].mxu1 }
 0x200   :  { %v398_v51 = vpop.f32.mrb[2].mxu0  ;;  %v406_v53 = vsel %vm308_vm2, %v402_v48, -inf }
 0x201   :  { %v1838_v52 = vpop.f32.mrb[3].mxu0 }
 0x203   :  { %407 = vmax.xlane.f32.xlu0 %v406_v53 }
 0x219   :  { %575 = vrot.lane.b32.xlu0 %v2344_v23, %s2145_s3 }
 0x28c   :  { %v405_v54 = vpop.xlane.xlu0 %404 }
 0x28d   :  { %v409_v55 = vsub.f32 %v401_v43, %v405_v54 }
 0x28f   :  { %v411_v56 = vmul.f32 1.442695, %v409_v55 }
 0x290   :  { %v408_v57 = vpop.xlane.xlu0 %407 }
 0x291   :  { %2004 = vpow2.f32 %v411_v56  ;;  %v410_v58 = vsub.f32 %v402_v48, %v408_v57 }
 0x293   :  { %v413_v59 = vmul.f32 1.442695, %v410_v58 }
 0x294   :  { %v576_v12 = vpop.permute.xlu0 %575 }
 0x295   :  { %2006 = vpow2.f32 %v413_v59  ;;  %v581_v14 = vsel %vm308_vm2, %v576_v12, 0 }
 0x29b   :  { %v2005_v60 = vpop.eup %2004 }
 0x29c   :  { %v415_v61 = vsel %vm308_vm2, %v2005_v60, 0.0 }
 0x29d   :  { %416 = vadd.xlane.f32.xlu1 %v415_v61 }
 0x29f   :  { %v2007_v62 = vpop.eup %2006 }
 0x2a0   :  { %v418_v63 = vsel %vm308_vm2, %v2007_v62, 0.0 }
 0x2a1   :  { %419 = vadd.xlane.f32.xlu1 %v418_v63 }
 0x2b2   :  { %627 = vrot.lane.b32.xlu1 %v2346_v26, %s2145_s3 }
 0x2b6   :  { %572 = vrot.lane.b32.xlu1 %v2354_v30, %s2145_s3 }
 0x2ba   :  { %624 = vrot.lane.b32.xlu1 %v2356_v31, %s2145_s3 }
 0x32a   :  { %v417_v1 = vpop.xlane.xlu1 %416 }
 0x32b   :  { %2008 = vrcp.f32 %v417_v1 }
 0x32e   :  { %v420_v2 = vpop.xlane.xlu1 %419 }
 0x32f   :  { %2010 = vrcp.f32 %v420_v2 }
 0x332   :  { %v628_v15 = vpop.permute.xlu1 %627 }
 0x333   :  { %v633_v27 = vsel %vm308_vm2, %v628_v15, 0 }
 0x335   :  { %v2009_v5 = vpop.eup %2008 }
 0x336   :  { %v423_v7 = vmul.f32 %v2009_v5, %v2005_v60  ;;  %v573_v16 = vpop.permute.xlu1 %572 }
 0x338   :  { %v425_v8 = vpack.c.bf16 %v423_v7, %v423_v7 }
 0x339   :  { %v2011_v10 = vpop.eup %2010 }
 0x33a   :  { %v424_v11 = vmul.f32 %v2011_v10, %v2007_v62  ;;  %1842 = vmatmul.mubr.msk.bf16.vlgmr.msra.gmra.mrb[16].mxu1 %vm308_vm2, %v425_v8  ;;  %v625_v35 = vpop.permute.xlu1 %624 }
 0x33b   :  { %1852 = vmatpush3.bf16.msra.mxu1 %v526_v9  ;;  %1853 = vmatprep.mubr.msk.bf16.mxu1 %vm2144_vm0, %v2143_v0 }
 0x33c   :  { %v426_v13 = vpack.c.bf16 %v424_v11, %v424_v11  ;;  %1863 = vmatprep.subr.bf16.mxu1 %v2143_v0 }
 0x33e   :  { %1848 = vmatmul.mubr.msk.bf16.vlgmr.msra.gmra.mrb[4].mxu0 %vm308_vm2, %v426_v13 }
 0x33f   :  { %1858 = vmatpush3.bf16.xpose.msra.mxu0 %v581_v14  ;;  %1859 = vmatprep.mubr.msk.bf16.mxu0 %vm2144_vm0, %v2143_v0 }
 0x340   :  { %1869 = vmatprep.subr.bf16.mxu0 %v2143_v0 }
 0x346   :  { %1860 = vmatmul.mubr.msk.bf16.vlgmr.msra.gmra.mrb[8].mxu0 %vm308_vm2, %v573_v16  ;;  %v801_v16 = vld [vmem:[#allocation7 + $0x4] sm:$0xf] }
 0x347   :  { %1871 = vmatprep.mubr.msk.bf16.mxu0 %vm2144_vm0, %v2143_v0 }
 0x40d   :  { %v468_v17 = vpop.f32.mrb[16].mxu1 }
 0x40e   :  { %v1843_v18 = vpop.f32.mrb[17].mxu1 }
 0x40f   :  { %v471_v19 = vpop.f32.mrb[18].mxu1 }
 0x410   :  { %v1844_v20 = vpop.f32.mrb[19].mxu1 }
 0x411   :  { %v514_v21 = vpop.f32.mrb[4].mxu0 }
 0x412   :  { %v520_v22 = vpack.c.bf16 %v514_v21, %v468_v17  ;;  %v1849_v24 = vpop.f32.mrb[5].mxu0  ;;  %v806_v17 = vsel %vm430_vm3, %v801_v16, 0 }
 0x413   :  { %v517_v25 = vpop.f32.mrb[6].mxu0 }
 0x414   :  { %v1850_v28 = vpop.f32.mrb[7].mxu0  ;;  %1854 = vmatmul.mubr.msk.bf16.vlgmr.msra.gmra.mrb[20].mxu1 %vm308_vm2, %v520_v22 }
 0x415   :  { %1864 = vmatpush3.bf16.xpose.msra.mxu1 %v633_v27  ;;  %1865 = vmatprep.mubr.msk.bf16.mxu1 %vm2144_vm0, %v2143_v0 }
 0x416   :  { %1875 = vmatprep.subr.bf16.mxu1 %v2143_v0 }
 0x419   :  { %v617_v29 = vpop.f32.mrb[8].mxu0 }
 0x41a   :  { %v675_v32 = vsel %vm299_vm4, -1.767767e+19, %v617_v29  ;;  %v1861_v34 = vpop.f32.mrb[9].mxu0 }
 0x41b   :  { %v620_v37 = vpop.f32.mrb[10].mxu0  ;;  %v677_v38 = vsel %vm308_vm2, %v675_v32, -inf }
 0x41c   :  { %678 = vmax.xlane.f32.xlu0 %v677_v38  ;;  %v1862_v39 = vpop.f32.mrb[11].mxu0  ;;  %1866 = vmatmul.mubr.msk.bf16.vlgmr.msra.gmra.mrb[24].mxu1 %vm308_vm2, %v625_v35 }
 0x41d   :  { %1877 = vmatprep.mubr.msk.bf16.mxu1 %vm2144_vm0, %v2143_v0 }
 0x4a9   :  { %v679_v42 = vpop.xlane.xlu0 %678 }
 0x4aa   :  { %v683_v43 = vsub.f32 %v675_v32, %v679_v42 }
 0x4ac   :  { %v685_v44 = vmul.f32 1.442695, %v683_v43 }
 0x4ae   :  { %2012 = vpow2.f32 %v685_v44 }
 0x4b8   :  { %v2013_v45 = vpop.eup %2012 }
 0x4b9   :  { %v689_v46 = vsel %vm308_vm2, %v2013_v45, 0.0 }
 0x4ba   :  { %690 = vadd.xlane.f32.xlu0 %v689_v46 }
 0x4e7   :  { %v2429_v47 = vpop.f32.mrb[20].mxu1 }
 0x4e8   :  { %v1855_v48 = vpop.f32.mrb[21].mxu1 }
 0x4e9   :  { %v2431_v49 = vpop.f32.mrb[22].mxu1 }
 0x4ea   :  { %v1856_v50 = vpop.f32.mrb[23].mxu1 }
 0x4ef   :  { %v669_v51 = vpop.f32.mrb[24].mxu1 }
 0x4f0   :  { %v676_v52 = vsel %vm300_vm5, -1.767767e+19, %v669_v51  ;;  %v1867_v53 = vpop.f32.mrb[25].mxu1  ;;  %v1704_v51 = vld [vmem:[%s2646_s8] ss:$0 sm:$0xff]  ;;  %s2147_s8 = smov 104  }
 0x4f1   :  { %v672_v54 = vpop.f32.mrb[26].mxu1  ;;  %v680_v55 = vsel %vm308_vm2, %v676_v52, -inf }
 0x4f2   :  { %681 = vmax.xlane.f32.xlu1 %v680_v55  ;;  %v1868_v56 = vpop.f32.mrb[27].mxu1  ;;  %v570_v54 = vadd.f32 %v1704_v51, %v2431_v49 }
 0x503   :  { %751 = vrot.lane.b32.xlu1 %v2368_v36, %s2145_s3 }
 0x507   :  { %853 = vrot.lane.b32.xlu1 %v2344_v23, %s2146_s22 }
 0x50b   :  { %903 = vrot.lane.b32.xlu1 %v2346_v26, %s2146_s22 }
 0x50f   :  { %901 = vrot.lane.b32.xlu1 %v2356_v31, %s2146_s22 }
 0x547   :  { %v691_v1 = vpop.xlane.xlu0 %690 }
 0x57f   :  { %v682_v57 = vpop.xlane.xlu1 %681 }
 0x580   :  { %v684_v58 = vsub.f32 %v676_v52, %v682_v57  ;;  %v569_v52 = vadd.f32 %v1704_v51, %v2429_v47 }
 0x582   :  { %v687_v59 = vmul.f32 1.442695, %v684_v58 }
 0x583   :  { %v752_v60 = vpop.permute.xlu1 %751 }
 0x584   :  { %2014 = vpow2.f32 %v687_v59  ;;  %v757_v61 = vsel %vm430_vm3, %v752_v60, 0 }
 0x585   :  { %1876 = vmatpush3.bf16.msra.mxu1 %v757_v61  ;;  %2016 = vrcp.f32 %v691_v1 }
 0x586   :  { %1887 = vmatprep.subr.bf16.mxu1 %v2143_v0 }
 0x587   :  { %v854_v12 = vpop.permute.xlu1 %853 }
 0x588   :  { %v859_v14 = vsel %vm308_vm2, %v854_v12, 0 }
 0x58b   :  { %v904_v22 = vpop.permute.xlu1 %903 }
 0x58c   :  { %v909_v29 = vsel %vm308_vm2, %v904_v22, 0 }
 0x58e   :  { %v2015_v62 = vpop.eup %2014 }
 0x58f   :  { %v692_v63 = vsel %vm308_vm2, %v2015_v62, 0.0  ;;  %v2017_v2 = vpop.eup %2016  ;;  %v902_v38 = vpop.permute.xlu1 %901 }
 0x590   :  { %693 = vadd.xlane.f32.xlu0 %v692_v63  ;;  %v697_v6 = vmul.f32 %v2017_v2, %v2013_v45 }
 0x592   :  { %v699_v9 = vpack.c.bf16 %v697_v6, %v697_v6 }
 0x5a6   :  { %702 = vrot.lane.b32.xlu0 %v2366_v33, %s2145_s3 }
 0x5aa   :  { %851 = vrot.lane.b32.xlu0 %v2354_v30, %s2146_s22 }
 0x61d   :  { %v694_v5 = vpop.xlane.xlu0 %693 }
 0x61e   :  { %2018 = vrcp.f32 %v694_v5 }
 0x621   :  { %v703_v7 = vpop.permute.xlu0 %702 }
 0x622   :  { %v708_v8 = vsel %vm430_vm3, %v703_v7, 0 }
 0x623   :  { %1870 = vmatpush3.bf16.msra.mxu0 %v708_v8 }
 0x624   :  { %1881 = vmatprep.subr.bf16.mxu0 %v2143_v0 }
 0x625   :  { %v852_v15 = vpop.permute.xlu0 %851 }
 0x626   :  { %1872 = vmatmul.mubr.msk.bf16.vlgmr.msra.gmra.mrb[12].mxu0 %vm308_vm2, %v699_v9 }
 0x627   :  { %1883 = vmatprep.mubr.msk.bf16.mxu0 %vm2144_vm0, %v2143_v0  ;;  %1882 = vmatpush3.bf16.msra.mxu0 %v806_v17 }
 0x628   :  { %v2019_v10 = vpop.eup %2018  ;;  %1893 = vmatprep.subr.bf16.mxu0 %v2143_v0 }
 0x629   :  { %v698_v11 = vmul.f32 %v2019_v10, %v2015_v62 }
 0x62b   :  { %v700_v13 = vpack.c.bf16 %v698_v11, %v698_v11 }
 0x62d   :  { %1878 = vmatmul.mubr.msk.bf16.vlgmr.msra.gmra.mrb[28].mxu1 %vm308_vm2, %v700_v13 }
 0x62e   :  { %1888 = vmatpush3.bf16.xpose.msra.mxu1 %v859_v14  ;;  %1889 = vmatprep.mubr.msk.bf16.mxu1 %vm2144_vm0, %v2143_v0 }
 0x62f   :  { %1899 = vmatprep.subr.bf16.mxu1 %v2143_v0 }
 0x635   :  { %1890 = vmatmul.mubr.msk.bf16.vlgmr.msra.gmra.mrb[32].mxu1 %vm308_vm2, %v852_v15 }
 0x636   :  { %1901 = vmatprep.mubr.msk.bf16.mxu1 %vm2144_vm0, %v2143_v0 }
 0x6f9   :  { %v744_v18 = vpop.f32.mrb[12].mxu0 }
 0x6fa   :  { %v1873_v19 = vpop.f32.mrb[13].mxu0 }
 0x6fb   :  { %v747_v20 = vpop.f32.mrb[14].mxu0  ;;  %v1075_v19 = vld [vmem:[#allocation7 + $0x8] sm:$0xf] }
 0x6fc   :  { %v1874_v21 = vpop.f32.mrb[15].mxu0  ;;  %v1080_v20 = vsel %vm430_vm3, %v1075_v19, 0 }
 0x700   :  { %v793_v24 = vpop.f32.mrb[28].mxu1 }
 0x701   :  { %v799_v25 = vpack.c.bf16 %v793_v24, %v744_v18  ;;  %v1879_v27 = vpop.f32.mrb[29].mxu1 }
 0x702   :  { %v796_v28 = vpop.f32.mrb[30].mxu1 }
 0x703   :  { %v1880_v32 = vpop.f32.mrb[31].mxu1  ;;  %1884 = vmatmul.mubr.msk.bf16.vlgmr.msra.gmra.mrb[16].mxu0 %vm308_vm2, %v799_v25 }
 0x704   :  { %1894 = vmatpush3.bf16.xpose.msra.mxu0 %v909_v29  ;;  %1895 = vmatprep.mubr.msk.bf16.mxu0 %vm2144_vm0, %v2143_v0 }
 0x705   :  { %1905 = vmatprep.subr.bf16.mxu0 %v2143_v0 }
 0x708   :  { %v895_v34 = vpop.f32.mrb[32].mxu1 }
 0x709   :  { %v951_v35 = vsel %vm299_vm4, -1.767767e+19, %v895_v34  ;;  %v1891_v37 = vpop.f32.mrb[33].mxu1 }
 0x70a   :  { %v898_v39 = vpop.f32.mrb[34].mxu1  ;;  %v953_v42 = vsel %vm308_vm2, %v951_v35, -inf }
 0x70b   :  { %1896 = vmatmul.mubr.msk.bf16.vlgmr.msra.gmra.mrb[20].mxu0 %vm308_vm2, %v902_v38  ;;  %954 = vmax.xlane.f32.xlu0 %v953_v42  ;;  %v1892_v43 = vpop.f32.mrb[35].mxu1 }
 0x70c   :  { %1907 = vmatprep.mubr.msk.bf16.mxu0 %vm2144_vm0, %v2143_v0 }
 0x798   :  { %v955_v44 = vpop.xlane.xlu0 %954 }
 0x799   :  { %v959_v45 = vsub.f32 %v951_v35, %v955_v44 }
 0x79b   :  { %v961_v46 = vmul.f32 1.442695, %v959_v45 }
 0x79d   :  { %2020 = vpow2.f32 %v961_v46 }
 0x7a7   :  { %v2021_v48 = vpop.eup %2020 }
 0x7a8   :  { %v965_v50 = vsel %vm308_vm2, %v2021_v48, 0.0 }
 0x7a9   :  { %966 = vadd.xlane.f32.xlu0 %v965_v50 }
 0x7d6   :  { %v842_v53 = vpop.f32.mrb[16].mxu0 }
 0x7d7   :  { %v2483_v55 = vadd.f32 %v842_v53, %v569_v52  ;;  %v1885_v56 = vpop.f32.mrb[17].mxu0 }
 0x7d8   :  { %v845_v57 = vpop.f32.mrb[18].mxu0 }
 0x7d9   :  { %v2485_v58 = vadd.f32 %v845_v57, %v570_v54  ;;  %v1886_v59 = vpop.f32.mrb[19].mxu0 }
 0x7de   :  { %v945_v60 = vpop.f32.mrb[20].mxu0 }
 0x7df   :  { %v952_v61 = vsel %vm300_vm5, -1.767767e+19, %v945_v60  ;;  %v1897_v62 = vpop.f32.mrb[21].mxu0 }
 0x7e0   :  { %v948_v63 = vpop.f32.mrb[22].mxu0  ;;  %v956_v1 = vsel %vm308_vm2, %v952_v61, -inf }
 0x7e1   :  { %957 = vmax.xlane.f32.xlu1 %v956_v1  ;;  %v1898_v47 = vpop.f32.mrb[23].mxu0 }
 0x7f2   :  { %1025 = vrot.lane.b32.xlu1 %v2368_v36, %s2146_s22 }
 0x7f6   :  { %1127 = vrot.lane.b32.xlu1 %v2344_v23, %s2147_s8 }
 0x7fa   :  { %1177 = vrot.lane.b32.xlu1 %v2346_v26, %s2147_s8 }
 0x7fe   :  { %1175 = vrot.lane.b32.xlu1 %v2356_v31, %s2147_s8 }
 0x836   :  { %v967_v23 = vpop.xlane.xlu0 %966 }
 0x86e   :  { %v958_v49 = vpop.xlane.xlu1 %957 }
 0x86f   :  { %v960_v2 = vsub.f32 %v952_v61, %v958_v49 }
 0x871   :  { %v963_v5 = vmul.f32 1.442695, %v960_v2 }
 0x872   :  { %v1026_v6 = vpop.permute.xlu1 %1025 }
 0x873   :  { %2022 = vpow2.f32 %v963_v5  ;;  %v1031_v7 = vsel %vm430_vm3, %v1026_v6, 0 }
 0x874   :  { %1906 = vmatpush3.bf16.msra.mxu0 %v1031_v7  ;;  %2024 = vrcp.f32 %v967_v23 }
 0x875   :  { %1917 = vmatprep.subr.bf16.mxu0 %v2143_v0 }
 0x876   :  { %v1128_v15 = vpop.permute.xlu1 %1127 }
 0x877   :  { %v1133_v17 = vsel %vm308_vm2, %v1128_v15, 0 }
 0x87a   :  { %v1178_v27 = vpop.permute.xlu1 %1177 }
 0x87b   :  { %v1183_v35 = vsel %vm308_vm2, %v1178_v27, 0 }
 0x87d   :  { %v2023_v8 = vpop.eup %2022 }
 0x87e   :  { %v968_v9 = vsel %vm308_vm2, %v2023_v8, 0.0  ;;  %v2025_v26 = vpop.eup %2024  ;;  %v1176_v43 = vpop.permute.xlu1 %1175 }
 0x87f   :  { %969 = vadd.xlane.f32.xlu0 %v968_v9  ;;  %v973_v10 = vmul.f32 %v2025_v26, %v2021_v48 }
 0x881   :  { %v975_v13 = vpack.c.bf16 %v973_v10, %v973_v10 }
 0x895   :  { %977 = vrot.lane.b32.xlu0 %v2366_v33, %s2146_s22 }
 0x899   :  { %1125 = vrot.lane.b32.xlu0 %v2354_v30, %s2147_s8 }
 0x90c   :  { %v970_v31 = vpop.xlane.xlu0 %969 }
 0x90d   :  { %2026 = vrcp.f32 %v970_v31 }
 0x910   :  { %v978_v11 = vpop.permute.xlu0 %977 }
 0x911   :  { %v983_v12 = vsel %vm430_vm3, %v978_v11, 0 }
 0x912   :  { %1900 = vmatpush3.bf16.msra.mxu1 %v983_v12 }
 0x913   :  { %1911 = vmatprep.subr.bf16.mxu1 %v2143_v0 }
 0x914   :  { %v1126_v18 = vpop.permute.xlu0 %1125 }
 0x915   :  { %1902 = vmatmul.mubr.msk.bf16.vlgmr.msra.gmra.mrb[36].mxu1 %vm308_vm2, %v975_v13  ;;  %v1349_v13 = vld [vmem:[#allocation7 + $0xc] sm:$0xf] }
 0x916   :  { %1913 = vmatprep.mubr.msk.bf16.mxu1 %vm2144_vm0, %v2143_v0  ;;  %1912 = vmatpush3.bf16.msra.mxu1 %v1080_v20 }
 0x917   :  { %v2027_v14 = vpop.eup %2026  ;;  %1923 = vmatprep.subr.bf16.mxu1 %v2143_v0 }
 0x918   :  { %v974_v30 = vmul.f32 %v2027_v14, %v2023_v8  ;;  %v1354_v14 = vsel %vm430_vm3, %v1349_v13, 0 }
 0x91a   :  { %v976_v16 = vpack.c.bf16 %v974_v30, %v974_v30 }
 0x91c   :  { %1908 = vmatmul.mubr.msk.bf16.vlgmr.msra.gmra.mrb[24].mxu0 %vm308_vm2, %v976_v16 }
 0x91d   :  { %1918 = vmatpush3.bf16.xpose.msra.mxu0 %v1133_v17  ;;  %1919 = vmatprep.mubr.msk.bf16.mxu0 %vm2144_vm0, %v2143_v0 }
 0x91e   :  { %1929 = vmatprep.subr.bf16.mxu0 %v2143_v0 }
 0x924   :  { %1920 = vmatmul.mubr.msk.bf16.vlgmr.msra.gmra.mrb[28].mxu0 %vm308_vm2, %v1126_v18 }
 0x925   :  { %1931 = vmatprep.mubr.msk.bf16.mxu0 %vm2144_vm0, %v2143_v0 }
 0x9e8   :  { %v1019_v21 = vpop.f32.mrb[36].mxu1 }
 0x9e9   :  { %v1903_v22 = vpop.f32.mrb[37].mxu1 }
 0x9ea   :  { %v1022_v24 = vpop.f32.mrb[38].mxu1 }
 0x9eb   :  { %v1904_v25 = vpop.f32.mrb[39].mxu1 }
 0x9ef   :  { %v1067_v28 = vpop.f32.mrb[24].mxu0 }
 0x9f0   :  { %v1073_v29 = vpack.c.bf16 %v1067_v28, %v1019_v21  ;;  %v1909_v32 = vpop.f32.mrb[25].mxu0 }
 0x9f1   :  { %v1070_v34 = vpop.f32.mrb[26].mxu0 }
 0x9f2   :  { %v1910_v37 = vpop.f32.mrb[27].mxu0  ;;  %1914 = vmatmul.mubr.msk.bf16.vlgmr.msra.gmra.mrb[40].mxu1 %vm308_vm2, %v1073_v29 }
 0x9f3   :  { %1924 = vmatpush3.bf16.xpose.msra.mxu1 %v1183_v35  ;;  %1925 = vmatprep.mubr.msk.bf16.mxu1 %vm2144_vm0, %v2143_v0 }
 0x9f4   :  { %1935 = vmatprep.subr.bf16.mxu1 %v2143_v0 }
 0x9f7   :  { %v1169_v38 = vpop.f32.mrb[28].mxu0 }
 0x9f8   :  { %v1225_v39 = vsel %vm299_vm4, -1.767767e+19, %v1169_v38  ;;  %v1921_v42 = vpop.f32.mrb[29].mxu0 }
 0x9f9   :  { %v1172_v44 = vpop.f32.mrb[30].mxu0  ;;  %v1227_v45 = vsel %vm308_vm2, %v1225_v39, -inf }
 0x9fa   :  { %1228 = vmax.xlane.f32.xlu0 %v1227_v45  ;;  %v1922_v46 = vpop.f32.mrb[31].mxu0  ;;  %1926 = vmatmul.mubr.msk.bf16.vlgmr.msra.gmra.mrb[44].mxu1 %vm308_vm2, %v1176_v43 }
 0x9fb   :  { %1937 = vmatprep.mubr.msk.bf16.mxu1 %vm2144_vm0, %v2143_v0 }
 0xa87   :  { %v1229_v48 = vpop.xlane.xlu0 %1228 }
 0xa88   :  { %v1233_v50 = vsub.f32 %v1225_v39, %v1229_v48 }
 0xa8a   :  { %v1235_v51 = vmul.f32 1.442695, %v1233_v50 }
 0xa8c   :  { %2028 = vpow2.f32 %v1235_v51 }
 0xa96   :  { %v2029_v52 = vpop.eup %2028 }
 0xa97   :  { %v1239_v40 = vsel %vm308_vm2, %v2029_v52, 0.0 }
 0xa98   :  { %1240 = vadd.xlane.f32.xlu0 %v1239_v40  ;;  %v1996_v40 = vld [vmem:[%s2653_s15] sm:$0xff]  }
 0xac5   :  { %v1116_v53 = vpop.f32.mrb[40].mxu1 }
 0xac6   :  { %v1123_v54 = vadd.f32 %v1116_v53, %v2483_v55  ;;  %v1915_v56 = vpop.f32.mrb[41].mxu1  ;;  %v1997_v53 = vld [vmem:[%s2653_s15 + $0x8] sm:$0xff]  }
 0xac7   :  { %v1119_v57 = vpop.f32.mrb[42].mxu1  ;;  %v1999_v56 = vld [vmem:[%s2653_s15 + $0x18] sm:$0xff]  }
 0xac8   :  { %v1124_v59 = vadd.f32 %v1119_v57, %v2485_v58  ;;  %v1916_v60 = vpop.f32.mrb[43].mxu1  ;;  %v2000_v57 = vld [vmem:[%s2653_s15 + $0x20] sm:$0xff]  }
 0xacd   :  { %v1219_v61 = vpop.f32.mrb[44].mxu1 }
 0xace   :  { %v1226_v62 = vsel %vm300_vm5, -1.767767e+19, %v1219_v61  ;;  %v1927_v63 = vpop.f32.mrb[45].mxu1 }
 0xacf   :  { %v1222_v1 = vpop.f32.mrb[46].mxu1  ;;  %v1230_v47 = vsel %vm308_vm2, %v1226_v62, -inf }
 0xad0   :  { %1231 = vmax.xlane.f32.xlu1 %v1230_v47  ;;  %v1928_v49 = vpop.f32.mrb[47].mxu1 }
 0xae1   :  { %1299 = vrot.lane.b32.xlu1 %v2368_v36, %s2147_s8 }
 0xb25   :  { %v1241_v8 = vpop.xlane.xlu0 %1240 }
 0xb5d   :  { %v1232_v2 = vpop.xlane.xlu1 %1231 }
 0xb5e   :  { %v1234_v55 = vsub.f32 %v1226_v62, %v1232_v2  ;;  %v1725_v2 = vld [vmem:[%s2647_s9] ss:$0 sm:$0xff] }
 0xb60   :  { %v1237_v5 = vmul.f32 1.442695, %v1234_v55 }
 0xb61   :  { %v1300_v6 = vpop.permute.xlu1 %1299 }
 0xb62   :  { %2030 = vpow2.f32 %v1237_v5  ;;  %v1305_v58 = vsel %vm430_vm3, %v1300_v6, 0 }
 0xb63   :  { %1936 = vmatpush3.bf16.msra.mxu1 %v1305_v58  ;;  %2032 = vrcp.f32 %v1241_v8 }
 0xb64   :  { %1947 = vmatprep.subr.bf16.mxu1 %v2143_v0 }
 0xb6c   :  { %v2031_v41 = vpop.eup %2030 }
 0xb6d   :  { %v1242_v7 = vsel %vm308_vm2, %v2031_v41, 0.0  ;;  %v2033_v36 = vpop.eup %2032 }
 0xb6e   :  { %1243 = vadd.xlane.f32.xlu0 %v1242_v7  ;;  %v1247_v23 = vmul.f32 %v2033_v36, %v2029_v52  ;;  %v1995_v52 = vld [vmem:[%s2651_s13 + $0x8] sm:$0xff]  }
 0xb70   :  { %v1249_v10 = vpack.c.bf16 %v1247_v23, %v1247_v23  ;;  %v2002_v23 = vld [vmem:[%s2653_s15 + $0x30] sm:$0xff]  }
 0xb84   :  { %1251 = vrot.lane.b32.xlu0 %v2366_v33, %s2147_s8 }
 0xbfb   :  { %v1244_v9 = vpop.xlane.xlu0 %1243 }
 0xbfc   :  { %2034 = vrcp.f32 %v1244_v9 }
 0xbff   :  { %v1252_v26 = vpop.permute.xlu0 %1251 }
 0xc00   :  { %v1257_v31 = vsel %vm430_vm3, %v1252_v26, 0  ;;  %v2003_v26 = vld [vmem:[%s2653_s15 + $0x38] sm:$0xff]  }
 0xc01   :  { %1930 = vmatpush3.bf16.msra.mxu0 %v1257_v31  ;;  %v1727_v31 = vld [vmem:[%s2652_s14] ss:$0 sm:$0xff] }
 0xc02   :  { %1941 = vmatprep.subr.bf16.mxu0 %v2143_v0 }
 0xc04   :  { %1932 = vmatmul.mubr.msk.bf16.vlgmr.msra.gmra.mrb[32].mxu0 %vm308_vm2, %v1249_v10 }
 0xc05   :  { %1943 = vmatprep.mubr.msk.bf16.mxu0 %vm2144_vm0, %v2143_v0  ;;  %1942 = vmatpush3.bf16.msra.mxu0 %v1354_v14 }
 0xc06   :  { %v2035_v11 = vpop.eup %2034  ;;  %1955 = vmatprep.subr.bf16.mxu0 %v2143_v0 }
 0xc07   :  { %v1248_v33 = vmul.f32 %v2035_v11, %v2031_v41  ;;  %v1726_v41 = vld [vmem:[%s2648_s10] ss:$0 sm:$0xff] }
 0xc09   :  { %v1250_v12 = vpack.c.bf16 %v1248_v33, %v1248_v33 }
 0xc0b   :  { %1938 = vmatmul.mubr.msk.bf16.vlgmr.msra.gmra.mrb[48].mxu1 %vm308_vm2, %v1250_v12 }
 0xc0c   :  { %1951 = vmatprep.mubr.msk.bf16.mxu1 %vm2144_vm0, %v2143_v0 }
 0xcd7   :  { %v1293_v30 = vpop.f32.mrb[32].mxu0 }
 0xcd8   :  { %v1933_v15 = vpop.f32.mrb[33].mxu0 }
 0xcd9   :  { %v1296_v16 = vpop.f32.mrb[34].mxu0 }
 0xcda   :  { %v1934_v17 = vpop.f32.mrb[35].mxu0 }
 0xcde   :  { %v1341_v18 = vpop.f32.mrb[48].mxu1 }
 0xcdf   :  { %v1347_v19 = vpack.c.bf16 %v1341_v18, %v1293_v30  ;;  %v1939_v20 = vpop.f32.mrb[49].mxu1 }
 0xce0   :  { %v1344_v21 = vpop.f32.mrb[50].mxu1 }
 0xce1   :  { %v1940_v22 = vpop.f32.mrb[51].mxu1  ;;  %1944 = vmatmul.mubr.msk.bf16.vlgmr.msra.gmra.mrb[36].mxu0 %vm308_vm2, %v1347_v19 }
 0xce2   :  { %1971 = vmatprep.mubr.msk.bf16.mxu0 %vm2144_vm0, %v2143_v0  ;;  %1956 = vmatpush3.bf16.msra.mxu0 %v1996_v40 }
 0xce3   :  { %1957 = vmatprep.subr.bf16.mxu0 %v2143_v0 }
 0xce6   :  { %1958 = vmatpush3.bf16.msra.mxu0 %v1997_v53 }
 0xce7   :  { %1959 = vmatprep.subr.bf16.mxu0 %v2143_v0 }
 0xdb4   :  { %v1390_v24 = vpop.f32.mrb[36].mxu0 }
 0xdb5   :  { %v1397_v25 = vadd.f32 %v1390_v24, %v1123_v54  ;;  %v1945_v27 = vpop.f32.mrb[37].mxu0  ;;  %v1998_v54 = vld [vmem:[%s2653_s15 + $0x10] sm:$0xff]  }
 0xdb6   :  { %v1393_v28 = vpop.f32.mrb[38].mxu0  ;;  %1960 = vmatpush3.bf16.msra.mxu0 %v1998_v54  ;;  %v1741_v54 = vld [vmem:[%s2650_s12] ss:$0 sm:$0xff] }
 0xdb7   :  { %v1398_v29 = vadd.f32 %v1393_v28, %v1124_v59  ;;  %v1946_v32 = vpop.f32.mrb[39].mxu0  ;;  %v1399_v34 = vadd.f32 %v1397_v25, %v2302_v3  ;;  %1961 = vmatprep.subr.bf16.mxu0 %v2143_v0  ;;  %v2001_v59 = vld [vmem:[%s2653_s15 + $0x28] sm:$0xff]  }
 0xdb9   :  { %v1403_v35 = vsel %vm124_vm1, %v1399_v34, 0.0  ;;  %v1400_v37 = vadd.f32 %v1398_v29, %v2307_v4  ;;  %v1994_v4 = vld [vmem:[%s2651_s13] sm:$0xff]  }
 0xdba   :  { %1404 = vadd.xlane.f32.xlu1 %v1403_v35  ;;  %1948 = vmatpush3.bf16.msra.mxu1 %v1994_v4 }
 0xdbb   :  { %v1406_v38 = vsel %vm124_vm1, %v1400_v37, 0.0  ;;  %1949 = vmatprep.subr.bf16.mxu1 %v2143_v0  ;;  %1962 = vmatpush3.bf16.msra.mxu0 %v1999_v56 }
 0xdbc   :  { %1407 = vadd.xlane.f32.xlu0 %v1406_v38  ;;  %1963 = vmatprep.subr.bf16.mxu0 %v2143_v0 }
 0xdbe   :  { %1950 = vmatpush3.bf16.msra.mxu1 %v1995_v52  ;;  %v1740_v52 = vld [vmem:[%s2649_s11] ss:$0 sm:$0xff] }
 0xdbf   :  { %1964 = vmatpush3.bf16.msra.mxu0 %v2000_v57 }
 0xdc0   :  { %1965 = vmatprep.subr.bf16.mxu0 %v2143_v0 }
 0xdc3   :  { %1966 = vmatpush3.bf16.msra.mxu0 %v2001_v59 }
 0xdc4   :  { %1967 = vmatprep.subr.bf16.mxu0 %v2143_v0 }
 0xdc7   :  { %1968 = vmatpush3.bf16.msra.mxu0 %v2002_v23 }
 0xdc8   :  { %1969 = vmatprep.subr.bf16.mxu0 %v2143_v0  ;;  %v1731_v0 = vld [vmem:[%s2654_s16] ss:$0 sm:$0xff] }
 0xdcb   :  { %1970 = vmatpush3.bf16.msra.mxu0 %v2003_v26 }
 0xe47   :  { %v1405_v39 = vpop.xlane.xlu1 %1404 }
 0xe48   :  { %v1410_v42 = vmul.f32 0.03125, %v1405_v39 }
 0xe49   :  { %v1408_v43 = vpop.xlane.xlu0 %1407 }
 0xe4a   :  { %v1412_v44 = vsub.f32 %v1399_v34, %v1410_v42  ;;  %v1411_v45 = vmul.f32 0.03125, %v1408_v43 }
 0xe4c   :  { %v1413_v46 = vsub.f32 %v1400_v37, %v1411_v45  ;;  %v1414_v48 = vmul.f32 %v1412_v44, %v1412_v44 }
 0xe4e   :  { %v1416_v50 = vsel %vm124_vm1, %v1414_v48, 0.0  ;;  %v1415_v51 = vmul.f32 %v1413_v46, %v1413_v46 }
 0xe4f   :  { %1417 = vadd.xlane.f32.xlu0 %v1416_v50 }
 0xe50   :  { %v1419_v3 = vsel %vm124_vm1, %v1415_v51, 0.0 }
 0xe51   :  { %1420 = vadd.xlane.f32.xlu1 %v1419_v3 }
 0xedc   :  { %v1418_v60 = vpop.xlane.xlu0 %1417 }
 0xedd   :  { %v1422_v61 = vmul.f32 0.03125, %v1418_v60 }
 0xede   :  { %v1421_v62 = vpop.xlane.xlu1 %1420 }
 0xedf   :  { %v1424_v63 = vadd.f32 1e-05, %v1422_v61  ;;  %v1423_v1 = vmul.f32 0.03125, %v1421_v62 }
 0xee1   :  { %2036 = vrsqrt.f32 %v1424_v63  ;;  %v1425_v47 = vadd.f32 1e-05, %v1423_v1 }
 0xee3   :  { %2038 = vrsqrt.f32 %v1425_v47 }
 0xeeb   :  { %v2037_v49 = vpop.eup %2036 }
 0xeec   :  { %v1428_v55 = vmul.f32 %v2037_v49, %v1412_v44 }
 0xeed   :  { %v2039_v5 = vpop.eup %2038 }
 0xeee   :  { %v1436_v6 = vmul.f32 %v1725_v2, %v1428_v55  ;;  %v1429_v58 = vmul.f32 %v2039_v5, %v1413_v46 }
 0xef0   :  { %v1437_v7 = vmul.f32 %v1725_v2, %v1429_v58  ;;  %v1444_v8 = vadd.f32 %v1726_v41, %v1436_v6 }
 0xef2   :  { %v1445_v36 = vadd.f32 %v1726_v41, %v1437_v7 }
 0xef4   :  { %v1446_v9 = vpack.c.bf16 %v1445_v36, %v1444_v8 }
 0xef6   :  { %1952 = vmatmul.mubr.msk.bf16.vlgmr.msra.gmra.mrb[52].mxu1 %vm124_vm1, %v1446_v9 }
 0xfc9   :  { %v1507_v10 = vpop.f32.mrb[52].mxu1 }
 0xfca   :  { %v1508_v11 = vadd.f32 %v1727_v31, %v1507_v10  ;;  %v1953_v33 = vpop.f32.mrb[53].mxu1 }
 0xfcb   :  { %v1510_v12 = vpop.f32.mrb[54].mxu1 }
 0xfcc   :  { %v1511_v13 = vadd.f32 %v1727_v31, %v1510_v12  ;;  %v1954_v14 = vpop.f32.mrb[55].mxu1  ;;  %v1514_v30 = vmax.f32 %v1508_v11, 0.0 }
 0xfce   :  { %v1515_v15 = vmax.f32 %v1511_v13, 0.0 }
 0xfd0   :  { %v1516_v16 = vpack.c.bf16 %v1515_v15, %v1514_v30 }
 0xfd2   :  { %1972 = vmatmul.mubr.bf16.vlgmr.msra.gmra.mrb[40].mxu0 %v1516_v16 }
0x10a5   :  { %v1622_v17 = vpop.f32.mrb[40].mxu0 }
0x10a6   :  { %v1623_v18 = vadd.f32 %v1731_v0, %v1622_v17  ;;  %v1973_v19 = vpop.f32.mrb[41].mxu0 }
0x10a7   :  { %v1625_v20 = vpop.f32.mrb[42].mxu0 }
0x10a8   :  { %v1626_v21 = vadd.f32 %v1731_v0, %v1625_v20  ;;  %v1974_v22 = vpop.f32.mrb[43].mxu0  ;;  %v1629_v24 = vadd.f32 %v1623_v18, %v1444_v8 }
0x10aa   :  { %v1633_v25 = vsel %vm124_vm1, %v1629_v24, 0.0  ;;  %v1630_v27 = vadd.f32 %v1626_v21, %v1445_v36 }
0x10ab   :  { %1634 = vadd.xlane.f32.xlu0 %v1633_v25 }
0x10ac   :  { %v1636_v28 = vsel %vm124_vm1, %v1630_v27, 0.0 }
0x10ad   :  { %1637 = vadd.xlane.f32.xlu1 %v1636_v28 }
0x1138   :  { %v1635_v29 = vpop.xlane.xlu0 %1634 }
0x1139   :  { %v1639_v32 = vmul.f32 0.03125, %v1635_v29 }
0x113a   :  { %v1638_v34 = vpop.xlane.xlu1 %1637 }
0x113b   :  { %v1641_v35 = vsub.f32 %v1629_v24, %v1639_v32  ;;  %v1640_v37 = vmul.f32 0.03125, %v1638_v34 }
0x113d   :  { %v1642_v38 = vsub.f32 %v1630_v27, %v1640_v37  ;;  %v1643_v39 = vmul.f32 %v1641_v35, %v1641_v35 }
0x113f   :  { %v1645_v42 = vsel %vm124_vm1, %v1643_v39, 0.0  ;;  %v1644_v43 = vmul.f32 %v1642_v38, %v1642_v38 }
0x1140   :  { %1646 = vadd.xlane.f32.xlu0 %v1645_v42 }
0x1141   :  { %v1648_v44 = vsel %vm124_vm1, %v1644_v43, 0.0 }
0x1142   :  { %1649 = vadd.xlane.f32.xlu1 %v1648_v44 }
0x11cd   :  { %v1647_v45 = vpop.xlane.xlu0 %1646 }
0x11ce   :  { %v1651_v46 = vmul.f32 0.03125, %v1647_v45 }
0x11cf   :  { %v1650_v48 = vpop.xlane.xlu1 %1649 }
0x11d0   :  { %v1653_v50 = vadd.f32 1e-05, %v1651_v46  ;;  %v1652_v51 = vmul.f32 0.03125, %v1650_v48 }
0x11d2   :  { %2040 = vrsqrt.f32 %v1653_v50  ;;  %v1654_v3 = vadd.f32 1e-05, %v1652_v51 }
0x11d4   :  { %2042 = vrsqrt.f32 %v1654_v3 }
0x11dc   :  { %v2041_v4 = vpop.eup %2040 }
0x11dd   :  { %v1657_v40 = vmul.f32 %v2041_v4, %v1641_v35 }
0x11de   :  { %v2043_v53 = vpop.eup %2042 }
0x11df   :  { %v1665_v56 = vmul.f32 %v1740_v52, %v1657_v40  ;;  %v1658_v57 = vmul.f32 %v2043_v53, %v1642_v38 }
0x11e1   :  { %v1666_v59 = vmul.f32 %v1740_v52, %v1658_v57  ;;  %v1673_v60 = vadd.f32 %v1741_v54, %v1665_v56 }
0x11e3   :  { %v1674_v61 = vadd.f32 %v1741_v54, %v1666_v59  ;;  %1675 = vst.msk [vmem:[#allocation8] sm:$0xff] %vm124_vm1, %v1673_v60 }
0x11e5   :  { %1676 = vst.msk [vmem:[#allocation8 + $0x8] sm:$0xff] %vm124_vm1, %v1674_v61 }
0x11e6   :  { %2121 = shalt.err (!%p2118_p0)
}
0x11e7   :  { %s2122_s29 = scalar_lea.hbm %s2655_s17, 256 }
0x11e8   :  { %p2123_p1 = scmp.ne.s32.totalorder %s2655_s17, %s2122_s29  ;;  %p2126_p2 = scmp.lt.u32.totalorder %s2122_s29, %s2655_s17 }
0x11ea   :  { %p2128_p3 = pnand %p2126_p2, %p2123_p1 }
0x11ec   :  { %2131 = shalt.err (!%p2128_p3)
}
0x11ed   :  { %s2149_s19 = smov 128   ;;  %s2150_s5 = smov 8  }
0x11ee   :  { %1688 = dma.vmem_to_hbm [thread:$0]  %s1683_s26, 256, %s2655_s17, [#allocation4], %s2149_s19, %s2149_s19, %s2150_s5  }
0x11ef   :  { %2136 = dma.done.wait [#allocation4], 256  }
0x11f0   :  { %2137 = vsyncadd [#allocation4], 4294967040 }
0x11f1   :  { %1692 = vsyncpa [#allocation3], 1 }
0x11f2   :  { %1693 = vsyncpa [#allocation6], 1 }
0x11f3   :  { %1694 = vsyncpa [#allocation4], 1 }

</bundles_post_ra>
